<compile_context>
chip_gen: v7x
topology: tpu7x:2x2x1
jax: 0.10.0
libtpu: 0.0.40
codegen_flags: <defaults>
</compile_context>

<pallas_src>
import jax
import jax.numpy as jnp
from jax.experimental import pallas as pl
from jax.experimental.pallas import tpu as pltpu


def _fused_conv_relu_kernel(x_ref, w1_ref, s1_ref, b1_ref,
                            w2_ref, s2_ref, b2_ref, o_ref,
                            xpad_ref, midpad_ref):
    """Fused (Conv3x3 pad=1 -> BN -> ReLU) x 2 for one batch element.

    x_ref:       (1, H, W, Cin)      unpadded input (f32)
    w1_ref:      (9, Cin, Cout)      layer-1 weights, tap-major HWIO, bf16
    s1/b1_ref:   (1, Cout)           folded BN scale / bias (f32)
    w2_ref:      (9, Cout, Cout)     layer-2 weights, tap-major HWIO, bf16
    s2/b2_ref:   (1, Cout)           folded BN scale / bias (f32)
    o_ref:       (1, H, W, Cout)     output block
    xpad_ref:    (H+2, W+2, Cin)     VMEM scratch: padded layer-1 input
    midpad_ref:  (H+2, W+2, Cout)    VMEM scratch: padded layer-1 output
    """
    H = x_ref.shape[1]
    W = x_ref.shape[2]
    cout = w1_ref.shape[2]

    def conv_bn_relu(pad_ref, w_ref, s_ref, b_ref):
        cin = pad_ref.shape[-1]
        acc = jnp.zeros((H * W, cout), jnp.float32)
        # 3x3 conv = 9 shifted (H*W, Cin) x (Cin, Cout) MXU contractions,
        # bf16 operands, f32 accumulation.
        for dy in range(3):
            for dx in range(3):
                patch = pad_ref[dy:dy + H, dx:dx + W, :]          # (H, W, cin)
                lhs = patch.reshape(H * W, cin).astype(jnp.bfloat16)
                acc = acc + jax.lax.dot_general(
                    lhs, w_ref[dy * 3 + dx],
                    dimension_numbers=(((1,), (0,)), ((), ())),
                    preferred_element_type=jnp.float32)
        y = acc * s_ref[0] + b_ref[0]          # folded BN, f32 epilogue
        return jnp.maximum(y, 0.0)             # ReLU, (H*W, cout) f32

    # ---- layer 1: pad the input inside the kernel (VMEM scratch). ----------
    xpad_ref[...] = jnp.zeros_like(xpad_ref)
    xpad_ref[1:H + 1, 1:W + 1, :] = x_ref[0].astype(xpad_ref.dtype)
    y1 = conv_bn_relu(xpad_ref, w1_ref, s1_ref, b1_ref)

    # ---- layer 2: the intermediate activation stays in VMEM (padded). ------
    midpad_ref[...] = jnp.zeros_like(midpad_ref)
    midpad_ref[1:H + 1, 1:W + 1, :] = y1.reshape(H, W, cout).astype(
        midpad_ref.dtype)
    y2 = conv_bn_relu(midpad_ref, w2_ref, s2_ref, b2_ref)

    # ---- layer 3 (Dropout) is identity in eval mode. ------------------------
    o_ref[0] = y2.reshape(H, W, cout).astype(o_ref.dtype)


def conv_relu_fused_nhwc(x_nhwc, p):
    """Both (Conv3x3 -> BN -> ReLU) blocks in one pallas_call. NHWC in/out."""
    N, H, W, Cin = x_nhwc.shape
    Cout = p["w1"].shape[-1]
    Hp, Wp = H + 2, W + 2

    return pl.pallas_call(
        _fused_conv_relu_kernel,
        out_shape=jax.ShapeDtypeStruct((N, H, W, Cout), x_nhwc.dtype),
        grid_spec=pltpu.PrefetchScalarGridSpec(
            num_scalar_prefetch=0,
            grid=(N,),
            in_specs=[
                pl.BlockSpec((1, H, W, Cin), lambda n: (n, 0, 0, 0)),
                pl.BlockSpec((9, Cin, Cout), lambda n: (0, 0, 0)),
                pl.BlockSpec((1, Cout), lambda n: (0, 0)),
                pl.BlockSpec((1, Cout), lambda n: (0, 0)),
                pl.BlockSpec((9, Cout, Cout), lambda n: (0, 0, 0)),
                pl.BlockSpec((1, Cout), lambda n: (0, 0)),
                pl.BlockSpec((1, Cout), lambda n: (0, 0)),
            ],
            out_specs=pl.BlockSpec((1, H, W, Cout), lambda n: (n, 0, 0, 0)),
            scratch_shapes=[
                pltpu.VMEM((Hp, Wp, Cin), jnp.float32),
                pltpu.VMEM((Hp, Wp, Cout), jnp.float32),
            ],
        ),
        compiler_params=pltpu.CompilerParams(
            dimension_semantics=("parallel",)),
    )(x_nhwc, p["w1"], p["s1"], p["b1"], p["w2"], p["s2"], p["b2"])


def init_params(key, in_channels, out_channels):
    """Deterministic synthetic parameters with the PyTorch module's shapes."""
    ks = jax.random.split(key, 8)

    def conv_w(k, cin, cout):
        bound = 1.0 / jnp.sqrt(cin * 3 * 3)
        return jax.random.uniform(k, (cout, cin, 3, 3), jnp.float32,
                                  -bound, bound)          # OIHW (PyTorch)

    def conv_b(k, cin, cout):
        bound = 1.0 / jnp.sqrt(cin * 3 * 3)
        return jax.random.uniform(k, (cout,), jnp.float32, -bound, bound)

    return {
        "w1": conv_w(ks[0], in_channels, out_channels),
        "b1": conv_b(ks[1], in_channels, out_channels),
        "gamma1": jnp.ones((out_channels,), jnp.float32),
        "beta1": jnp.zeros((out_channels,), jnp.float32),
        "mean1": 0.05 * jax.random.normal(ks[2], (out_channels,), jnp.float32),
        "var1": jnp.abs(1.0 + 0.05 * jax.random.normal(
            ks[3], (out_channels,), jnp.float32)),
        "w2": conv_w(ks[4], out_channels, out_channels),
        "b2": conv_b(ks[5], out_channels, out_channels),
        "gamma2": jnp.ones((out_channels,), jnp.float32),
        "beta2": jnp.zeros((out_channels,), jnp.float32),
        "mean2": 0.05 * jax.random.normal(ks[6], (out_channels,), jnp.float32),
        "var2": jnp.abs(1.0 + 0.05 * jax.random.normal(
            ks[7], (out_channels,), jnp.float32)),
    }


def prepare_params(raw, eps=1e-5):
    """One-time packing: fold conv bias + BN(eval) into per-channel scale/bias
    and pre-pack weights OIHW -> HWIO -> (9, Cin, Cout) bf16 (done outside the
    jitted forward so no per-call transposes)."""
    def fold(w_oihw, b, gamma, beta, mean, var):
        cout, cin = w_oihw.shape[0], w_oihw.shape[1]
        w_hwio = jnp.transpose(w_oihw, (2, 3, 1, 0))          # (3,3,Cin,Cout)
        w_tap = w_hwio.reshape(9, cin, cout).astype(jnp.bfloat16)
        scale = (gamma / jnp.sqrt(var + eps)).astype(jnp.float32)
        bias = (beta + (b - mean) * scale).astype(jnp.float32)
        return w_tap, scale.reshape(1, cout), bias.reshape(1, cout)

    w1, s1, b1 = fold(raw["w1"], raw["b1"], raw["gamma1"], raw["beta1"],
                      raw["mean1"], raw["var1"])
    w2, s2, b2 = fold(raw["w2"], raw["b2"], raw["gamma2"], raw["beta2"],
                      raw["mean2"], raw["var2"])
    return {"w1": w1, "s1": s1, "b1": b1, "w2": w2, "s2": s2, "b2": b2}


@jax.jit
def conv_relu_forward(x_nchw, prepared):
    """Full convReLU.forward. NCHW in/out to match the PyTorch module."""
    x = jnp.transpose(x_nchw, (0, 2, 3, 1))      # NCHW -> NHWC (module boundary)
    y = conv_relu_fused_nhwc(x, prepared)
    return jnp.transpose(y, (0, 3, 1, 2))        # NHWC -> NCHW


def _reference_forward(x_nchw, raw, eps=1e-5):
    """Pure-XLA f32 reference of the module's eval-mode forward."""
    x = jnp.transpose(x_nchw, (0, 2, 3, 1))

    def block(x, w_oihw, b, g, bt, m, v):
        w = jnp.transpose(w_oihw, (2, 3, 1, 0))
        y = jax.lax.conv_general_dilated(
            x, w, window_strides=(1, 1), padding="SAME",
            dimension_numbers=("NHWC", "HWIO", "NHWC"))
        y = (y + b - m) / jnp.sqrt(v + eps) * g + bt
        return jnp.maximum(y, 0.0)

    x = block(x, raw["w1"], raw["b1"], raw["gamma1"], raw["beta1"],
              raw["mean1"], raw["var1"])
    x = block(x, raw["w2"], raw["b2"], raw["gamma2"], raw["beta2"],
              raw["mean2"], raw["var2"])
    return jnp.transpose(x, (0, 3, 1, 2))


if __name__ == "__main__":
    key = jax.random.PRNGKey(0)
    k_x, k_p = jax.random.split(key)

    N, Cin, H, W = 2, 4, 16, 16
    Cout = 8

    x = jax.random.normal(k_x, (N, Cin, H, W), jnp.float32)
    raw = init_params(k_p, Cin, Cout)
    prepared = prepare_params(raw)

    out = conv_relu_forward(x, prepared)
    jax.block_until_ready(out)

    assert out.shape == (N, Cout, H, W), out.shape
    assert bool(jnp.all(out >= 0.0))                  # ReLU output >= 0

    ref = _reference_forward(x, raw)
    max_err = float(jnp.max(jnp.abs(out - ref)))
    assert max_err < 0.25, max_err                    # bf16 MXU vs f32 reference

    print("KERNEL_OK")
</pallas_src>

<mosaic_0001>
module attributes {stable_mosaic.version = 11 : i64} {
  func.func @_fused_conv_relu_kernel(%arg0: i32, %arg1: memref<1x16x16x4xf32, #tpu.memory_space<vmem>>, %arg2: memref<9x4x8xbf16, #tpu.memory_space<vmem>>, %arg3: memref<1x8xf32, #tpu.memory_space<vmem>>, %arg4: memref<1x8xf32, #tpu.memory_space<vmem>>, %arg5: memref<9x8x8xbf16, #tpu.memory_space<vmem>>, %arg6: memref<1x8xf32, #tpu.memory_space<vmem>>, %arg7: memref<1x8xf32, #tpu.memory_space<vmem>>, %arg8: memref<1x16x16x8xf32, #tpu.memory_space<vmem>>, %arg9: memref<18x18x4xf32, #tpu.memory_space<vmem>>, %arg10: memref<18x18x8xf32, #tpu.memory_space<vmem>>) attributes {dimension_semantics = [#tpu.dimension_semantics<parallel>], iteration_bounds = array<i64: 2>, scalar_prefetch = 0 : i64, scratch_operands = 2 : i64, tpu.core_type = #tpu.core_type<tc>, window_params = [{transform_indices = @transform_0, window_bounds = array<i64: 1, 16, 16, 4>}, {pipeline_mode = #tpu.pipeline_mode<synchronous>, transform_indices = @transform_1, window_bounds = array<i64: 9, 4, 8>}, {pipeline_mode = #tpu.pipeline_mode<synchronous>, transform_indices = @transform_2, window_bounds = array<i64: 1, 8>}, {pipeline_mode = #tpu.pipeline_mode<synchronous>, transform_indices = @transform_3, window_bounds = array<i64: 1, 8>}, {pipeline_mode = #tpu.pipeline_mode<synchronous>, transform_indices = @transform_4, window_bounds = array<i64: 9, 8, 8>}, {pipeline_mode = #tpu.pipeline_mode<synchronous>, transform_indices = @transform_5, window_bounds = array<i64: 1, 8>}, {pipeline_mode = #tpu.pipeline_mode<synchronous>, transform_indices = @transform_6, window_bounds = array<i64: 1, 8>}, {transform_indices = @transform_7, window_bounds = array<i64: 1, 16, 16, 8>}]} {
    %cst = arith.constant 0.000000e+00 : f32
    %0 = vector.broadcast %cst : f32 to vector<18x18x4xf32>
    %c0 = arith.constant 0 : index
    %c0_0 = arith.constant 0 : index
    %c0_1 = arith.constant 0 : index
    %1 = vector.load %arg9[%c0, %c0_0, %c0_1] : memref<18x18x4xf32, #tpu.memory_space<vmem>>, vector<18x18x4xf32>
    tpu.vector_store %arg9[%c0, %c0_0, %c0_1], %0 {strides = array<i32>} : memref<18x18x4xf32, #tpu.memory_space<vmem>>, vector<18x18x4xf32>,
    %c0_2 = arith.constant 0 : index
    %c0_3 = arith.constant 0 : index
    %c0_4 = arith.constant 0 : index
    %c0_5 = arith.constant 0 : index
    %2 = vector.load %arg1[%c0_2, %c0_3, %c0_4, %c0_5] : memref<1x16x16x4xf32, #tpu.memory_space<vmem>>, vector<1x16x16x4xf32>
    %3 = vector.shape_cast %2 : vector<1x16x16x4xf32> to vector<16x16x4xf32>
    %c1 = arith.constant 1 : index
    %c1_6 = arith.constant 1 : index
    %c0_7 = arith.constant 0 : index
    %4 = vector.load %arg9[%c1, %c1_6, %c0_7] : memref<18x18x4xf32, #tpu.memory_space<vmem>>, vector<16x16x4xf32>
    tpu.vector_store %arg9[%c1, %c1_6, %c0_7], %3 {strides = array<i32>} : memref<18x18x4xf32, #tpu.memory_space<vmem>>, vector<16x16x4xf32>,
    %cst_8 = arith.constant 0.000000e+00 : f32
    %5 = vector.broadcast %cst_8 : f32 to vector<256x8xf32>
    %c0_9 = arith.constant 0 : index
    %c0_10 = arith.constant 0 : index
    %c0_11 = arith.constant 0 : index
    %6 = vector.load %arg9[%c0_9, %c0_10, %c0_11] : memref<18x18x4xf32, #tpu.memory_space<vmem>>, vector<16x16x4xf32>
    %7 = vector.shape_cast %6 : vector<16x16x4xf32> to vector<256x4xf32>
    %8 = arith.truncf %7 : vector<256x4xf32> to vector<256x4xbf16>
    %c0_12 = arith.constant 0 : index
    %c0_13 = arith.constant 0 : index
    %c0_14 = arith.constant 0 : index
    %9 = vector.load %arg2[%c0_12, %c0_13, %c0_14] : memref<9x4x8xbf16, #tpu.memory_space<vmem>>, vector<1x4x8xbf16>
    %10 = vector.shape_cast %9 : vector<1x4x8xbf16> to vector<4x8xbf16>
    %cst_15 = arith.constant dense<0.000000e+00> : vector<256x8xf32>
    %11 = tpu.matmul %8, %10, %cst_15 {dimension_numbers = #tpu.dot_dimension_numbers<[1], [0], [0], [1], [0, 0, 1, 1], [], []>} : vector<256x4xbf16>, vector<4x8xbf16>, vector<256x8xf32> -> vector<256x8xf32>
    %12 = arith.addf %5, %11 : vector<256x8xf32>
    %c0_16 = arith.constant 0 : index
    %c1_17 = arith.constant 1 : index
    %c0_18 = arith.constant 0 : index
    %13 = vector.load %arg9[%c0_16, %c1_17, %c0_18] : memref<18x18x4xf32, #tpu.memory_space<vmem>>, vector<16x16x4xf32>
    %14 = vector.shape_cast %13 : vector<16x16x4xf32> to vector<256x4xf32>
    %15 = arith.truncf %14 : vector<256x4xf32> to vector<256x4xbf16>
    %c1_19 = arith.constant 1 : index
    %c0_20 = arith.constant 0 : index
    %c0_21 = arith.constant 0 : index
    %16 = vector.load %arg2[%c1_19, %c0_20, %c0_21] : memref<9x4x8xbf16, #tpu.memory_space<vmem>>, vector<1x4x8xbf16>
    %17 = vector.shape_cast %16 : vector<1x4x8xbf16> to vector<4x8xbf16>
    %cst_22 = arith.constant dense<0.000000e+00> : vector<256x8xf32>
    %18 = tpu.matmul %15, %17, %cst_22 {dimension_numbers = #tpu.dot_dimension_numbers<[1], [0], [0], [1], [0, 0, 1, 1], [], []>} : vector<256x4xbf16>, vector<4x8xbf16>, vector<256x8xf32> -> vector<256x8xf32>
    %19 = arith.addf %12, %18 : vector<256x8xf32>
    %c0_23 = arith.constant 0 : index
    %c2 = arith.constant 2 : index
    %c0_24 = arith.constant 0 : index
    %20 = vector.load %arg9[%c0_23, %c2, %c0_24] : memref<18x18x4xf32, #tpu.memory_space<vmem>>, vector<16x16x4xf32>
    %21 = vector.shape_cast %20 : vector<16x16x4xf32> to vector<256x4xf32>
    %22 = arith.truncf %21 : vector<256x4xf32> to vector<256x4xbf16>
    %c2_25 = arith.constant 2 : index
    %c0_26 = arith.constant 0 : index
    %c0_27 = arith.constant 0 : index
    %23 = vector.load %arg2[%c2_25, %c0_26, %c0_27] : memref<9x4x8xbf16, #tpu.memory_space<vmem>>, vector<1x4x8xbf16>
    %24 = vector.shape_cast %23 : vector<1x4x8xbf16> to vector<4x8xbf16>
    %cst_28 = arith.constant dense<0.000000e+00> : vector<256x8xf32>
    %25 = tpu.matmul %22, %24, %cst_28 {dimension_numbers = #tpu.dot_dimension_numbers<[1], [0], [0], [1], [0, 0, 1, 1], [], []>} : vector<256x4xbf16>, vector<4x8xbf16>, vector<256x8xf32> -> vector<256x8xf32>
    %26 = arith.addf %19, %25 : vector<256x8xf32>
    %c1_29 = arith.constant 1 : index
    %c0_30 = arith.constant 0 : index
    %c0_31 = arith.constant 0 : index
    %27 = vector.load %arg9[%c1_29, %c0_30, %c0_31] : memref<18x18x4xf32, #tpu.memory_space<vmem>>, vector<16x16x4xf32>
    %28 = vector.shape_cast %27 : vector<16x16x4xf32> to vector<256x4xf32>
    %29 = arith.truncf %28 : vector<256x4xf32> to vector<256x4xbf16>
    %c3 = arith.constant 3 : index
    %c0_32 = arith.constant 0 : index
    %c0_33 = arith.constant 0 : index
    %30 = vector.load %arg2[%c3, %c0_32, %c0_33] : memref<9x4x8xbf16, #tpu.memory_space<vmem>>, vector<1x4x8xbf16>
    %31 = vector.shape_cast %30 : vector<1x4x8xbf16> to vector<4x8xbf16>
    %cst_34 = arith.constant dense<0.000000e+00> : vector<256x8xf32>
    %32 = tpu.matmul %29, %31, %cst_34 {dimension_numbers = #tpu.dot_dimension_numbers<[1], [0], [0], [1], [0, 0, 1, 1], [], []>} : vector<256x4xbf16>, vector<4x8xbf16>, vector<256x8xf32> -> vector<256x8xf32>
    %33 = arith.addf %26, %32 : vector<256x8xf32>
    %c1_35 = arith.constant 1 : index
    %c1_36 = arith.constant 1 : index
    %c0_37 = arith.constant 0 : index
    %34 = vector.load %arg9[%c1_35, %c1_36, %c0_37] : memref<18x18x4xf32, #tpu.memory_space<vmem>>, vector<16x16x4xf32>
    %35 = vector.shape_cast %34 : vector<16x16x4xf32> to vector<256x4xf32>
    %36 = arith.truncf %35 : vector<256x4xf32> to vector<256x4xbf16>
    %c4 = arith.constant 4 : index
    %c0_38 = arith.constant 0 : index
    %c0_39 = arith.constant 0 : index
    %37 = vector.load %arg2[%c4, %c0_38, %c0_39] : memref<9x4x8xbf16, #tpu.memory_space<vmem>>, vector<1x4x8xbf16>
    %38 = vector.shape_cast %37 : vector<1x4x8xbf16> to vector<4x8xbf16>
    %cst_40 = arith.constant dense<0.000000e+00> : vector<256x8xf32>
    %39 = tpu.matmul %36, %38, %cst_40 {dimension_numbers = #tpu.dot_dimension_numbers<[1], [0], [0], [1], [0, 0, 1, 1], [], []>} : vector<256x4xbf16>, vector<4x8xbf16>, vector<256x8xf32> -> vector<256x8xf32>
    %40 = arith.addf %33, %39 : vector<256x8xf32>
    %c1_41 = arith.constant 1 : index
    %c2_42 = arith.constant 2 : index
    %c0_43 = arith.constant 0 : index
    %41 = vector.load %arg9[%c1_41, %c2_42, %c0_43] : memref<18x18x4xf32, #tpu.memory_space<vmem>>, vector<16x16x4xf32>
    %42 = vector.shape_cast %41 : vector<16x16x4xf32> to vector<256x4xf32>
    %43 = arith.truncf %42 : vector<256x4xf32> to vector<256x4xbf16>
    %c5 = arith.constant 5 : index
    %c0_44 = arith.constant 0 : index
    %c0_45 = arith.constant 0 : index
    %44 = vector.load %arg2[%c5, %c0_44, %c0_45] : memref<9x4x8xbf16, #tpu.memory_space<vmem>>, vector<1x4x8xbf16>
    %45 = vector.shape_cast %44 : vector<1x4x8xbf16> to vector<4x8xbf16>
    %cst_46 = arith.constant dense<0.000000e+00> : vector<256x8xf32>
    %46 = tpu.matmul %43, %45, %cst_46 {dimension_numbers = #tpu.dot_dimension_numbers<[1], [0], [0], [1], [0, 0, 1, 1], [], []>} : vector<256x4xbf16>, vector<4x8xbf16>, vector<256x8xf32> -> vector<256x8xf32>
    %47 = arith.addf %40, %46 : vector<256x8xf32>
    %c2_47 = arith.constant 2 : index
    %c0_48 = arith.constant 0 : index
    %c0_49 = arith.constant 0 : index
    %48 = vector.load %arg9[%c2_47, %c0_48, %c0_49] : memref<18x18x4xf32, #tpu.memory_space<vmem>>, vector<16x16x4xf32>
    %49 = vector.shape_cast %48 : vector<16x16x4xf32> to vector<256x4xf32>
    %50 = arith.truncf %49 : vector<256x4xf32> to vector<256x4xbf16>
    %c6 = arith.constant 6 : index
    %c0_50 = arith.constant 0 : index
    %c0_51 = arith.constant 0 : index
    %51 = vector.load %arg2[%c6, %c0_50, %c0_51] : memref<9x4x8xbf16, #tpu.memory_space<vmem>>, vector<1x4x8xbf16>
    %52 = vector.shape_cast %51 : vector<1x4x8xbf16> to vector<4x8xbf16>
    %cst_52 = arith.constant dense<0.000000e+00> : vector<256x8xf32>
    %53 = tpu.matmul %50, %52, %cst_52 {dimension_numbers = #tpu.dot_dimension_numbers<[1], [0], [0], [1], [0, 0, 1, 1], [], []>} : vector<256x4xbf16>, vector<4x8xbf16>, vector<256x8xf32> -> vector<256x8xf32>
    %54 = arith.addf %47, %53 : vector<256x8xf32>
    %c2_53 = arith.constant 2 : index
    %c1_54 = arith.constant 1 : index
    %c0_55 = arith.constant 0 : index
    %55 = vector.load %arg9[%c2_53, %c1_54, %c0_55] : memref<18x18x4xf32, #tpu.memory_space<vmem>>, vector<16x16x4xf32>
    %56 = vector.shape_cast %55 : vector<16x16x4xf32> to vector<256x4xf32>
    %57 = arith.truncf %56 : vector<256x4xf32> to vector<256x4xbf16>
    %c7 = arith.constant 7 : index
    %c0_56 = arith.constant 0 : index
    %c0_57 = arith.constant 0 : index
    %58 = vector.load %arg2[%c7, %c0_56, %c0_57] : memref<9x4x8xbf16, #tpu.memory_space<vmem>>, vector<1x4x8xbf16>
    %59 = vector.shape_cast %58 : vector<1x4x8xbf16> to vector<4x8xbf16>
    %cst_58 = arith.constant dense<0.000000e+00> : vector<256x8xf32>
    %60 = tpu.matmul %57, %59, %cst_58 {dimension_numbers = #tpu.dot_dimension_numbers<[1], [0], [0], [1], [0, 0, 1, 1], [], []>} : vector<256x4xbf16>, vector<4x8xbf16>, vector<256x8xf32> -> vector<256x8xf32>
    %61 = arith.addf %54, %60 : vector<256x8xf32>
    %c2_59 = arith.constant 2 : index
    %c2_60 = arith.constant 2 : index
    %c0_61 = arith.constant 0 : index
    %62 = vector.load %arg9[%c2_59, %c2_60, %c0_61] : memref<18x18x4xf32, #tpu.memory_space<vmem>>, vector<16x16x4xf32>
    %63 = vector.shape_cast %62 : vector<16x16x4xf32> to vector<256x4xf32>
    %64 = arith.truncf %63 : vector<256x4xf32> to vector<256x4xbf16>
    %c8 = arith.constant 8 : index
    %c0_62 = arith.constant 0 : index
    %c0_63 = arith.constant 0 : index
    %65 = vector.load %arg2[%c8, %c0_62, %c0_63] : memref<9x4x8xbf16, #tpu.memory_space<vmem>>, vector<1x4x8xbf16>
    %66 = vector.shape_cast %65 : vector<1x4x8xbf16> to vector<4x8xbf16>
    %cst_64 = arith.constant dense<0.000000e+00> : vector<256x8xf32>
    %67 = tpu.matmul %64, %66, %cst_64 {dimension_numbers = #tpu.dot_dimension_numbers<[1], [0], [0], [1], [0, 0, 1, 1], [], []>} : vector<256x4xbf16>, vector<4x8xbf16>, vector<256x8xf32> -> vector<256x8xf32>
    %68 = arith.addf %61, %67 : vector<256x8xf32>
    %c0_65 = arith.constant 0 : index
    %c0_66 = arith.constant 0 : index
    %69 = vector.load %arg3[%c0_65, %c0_66] : memref<1x8xf32, #tpu.memory_space<vmem>>, vector<1x8xf32>
    %70 = vector.shape_cast %69 : vector<1x8xf32> to vector<8xf32>
    %71 = vector.shape_cast %70 : vector<8xf32> to vector<1x8xf32>
    %72 = vector.broadcast %71 : vector<1x8xf32> to vector<256x8xf32>
    %73 = arith.mulf %68, %72 : vector<256x8xf32>
    %c0_67 = arith.constant 0 : index
    %c0_68 = arith.constant 0 : index
    %74 = vector.load %arg4[%c0_67, %c0_68] : memref<1x8xf32, #tpu.memory_space<vmem>>, vector<1x8xf32>
    %75 = vector.shape_cast %74 : vector<1x8xf32> to vector<8xf32>
    %76 = vector.shape_cast %75 : vector<8xf32> to vector<1x8xf32>
    %77 = vector.broadcast %76 : vector<1x8xf32> to vector<256x8xf32>
    %78 = arith.addf %73, %77 : vector<256x8xf32>
    %cst_69 = arith.constant 0.000000e+00 : f32
    %79 = vector.broadcast %cst_69 : f32 to vector<256x8xf32>
    %80 = arith.maximumf %78, %79 : vector<256x8xf32>
    %cst_70 = arith.constant 0.000000e+00 : f32
    %81 = vector.broadcast %cst_70 : f32 to vector<18x18x8xf32>
    %c0_71 = arith.constant 0 : index
    %c0_72 = arith.constant 0 : index
    %c0_73 = arith.constant 0 : index
    %82 = vector.load %arg10[%c0_71, %c0_72, %c0_73] : memref<18x18x8xf32, #tpu.memory_space<vmem>>, vector<18x18x8xf32>
    tpu.vector_store %arg10[%c0_71, %c0_72, %c0_73], %81 {strides = array<i32>} : memref<18x18x8xf32, #tpu.memory_space<vmem>>, vector<18x18x8xf32>,
    %83 = vector.shape_cast %80 : vector<256x8xf32> to vector<16x16x8xf32>
    %c1_74 = arith.constant 1 : index
    %c1_75 = arith.constant 1 : index
    %c0_76 = arith.constant 0 : index
    %84 = vector.load %arg10[%c1_74, %c1_75, %c0_76] : memref<18x18x8xf32, #tpu.memory_space<vmem>>, vector<16x16x8xf32>
    tpu.vector_store %arg10[%c1_74, %c1_75, %c0_76], %83 {strides = array<i32>} : memref<18x18x8xf32, #tpu.memory_space<vmem>>, vector<16x16x8xf32>,
    %cst_77 = arith.constant 0.000000e+00 : f32
    %85 = vector.broadcast %cst_77 : f32 to vector<256x8xf32>
    %c0_78 = arith.constant 0 : index
    %c0_79 = arith.constant 0 : index
    %c0_80 = arith.constant 0 : index
    %86 = vector.load %arg10[%c0_78, %c0_79, %c0_80] : memref<18x18x8xf32, #tpu.memory_space<vmem>>, vector<16x16x8xf32>
    %87 = vector.shape_cast %86 : vector<16x16x8xf32> to vector<256x8xf32>
    %88 = arith.truncf %87 : vector<256x8xf32> to vector<256x8xbf16>
    %c0_81 = arith.constant 0 : index
    %c0_82 = arith.constant 0 : index
    %c0_83 = arith.constant 0 : index
    %89 = vector.load %arg5[%c0_81, %c0_82, %c0_83] : memref<9x8x8xbf16, #tpu.memory_space<vmem>>, vector<1x8x8xbf16>
    %90 = vector.shape_cast %89 : vector<1x8x8xbf16> to vector<8x8xbf16>
    %cst_84 = arith.constant dense<0.000000e+00> : vector<256x8xf32>
    %91 = tpu.matmul %88, %90, %cst_84 {dimension_numbers = #tpu.dot_dimension_numbers<[1], [0], [0], [1], [0, 0, 1, 1], [], []>} : vector<256x8xbf16>, vector<8x8xbf16>, vector<256x8xf32> -> vector<256x8xf32>
    %92 = arith.addf %85, %91 : vector<256x8xf32>
    %c0_85 = arith.constant 0 : index
    %c1_86 = arith.constant 1 : index
    %c0_87 = arith.constant 0 : index
    %93 = vector.load %arg10[%c0_85, %c1_86, %c0_87] : memref<18x18x8xf32, #tpu.memory_space<vmem>>, vector<16x16x8xf32>
    %94 = vector.shape_cast %93 : vector<16x16x8xf32> to vector<256x8xf32>
    %95 = arith.truncf %94 : vector<256x8xf32> to vector<256x8xbf16>
    %c1_88 = arith.constant 1 : index
    %c0_89 = arith.constant 0 : index
    %c0_90 = arith.constant 0 : index
    %96 = vector.load %arg5[%c1_88, %c0_89, %c0_90] : memref<9x8x8xbf16, #tpu.memory_space<vmem>>, vector<1x8x8xbf16>
    %97 = vector.shape_cast %96 : vector<1x8x8xbf16> to vector<8x8xbf16>
    %cst_91 = arith.constant dense<0.000000e+00> : vector<256x8xf32>
    %98 = tpu.matmul %95, %97, %cst_91 {dimension_numbers = #tpu.dot_dimension_numbers<[1], [0], [0], [1], [0, 0, 1, 1], [], []>} : vector<256x8xbf16>, vector<8x8xbf16>, vector<256x8xf32> -> vector<256x8xf32>
    %99 = arith.addf %92, %98 : vector<256x8xf32>
    %c0_92 = arith.constant 0 : index
    %c2_93 = arith.constant 2 : index
    %c0_94 = arith.constant 0 : index
    %100 = vector.load %arg10[%c0_92, %c2_93, %c0_94] : memref<18x18x8xf32, #tpu.memory_space<vmem>>, vector<16x16x8xf32>
    %101 = vector.shape_cast %100 : vector<16x16x8xf32> to vector<256x8xf32>
    %102 = arith.truncf %101 : vector<256x8xf32> to vector<256x8xbf16>
    %c2_95 = arith.constant 2 : index
    %c0_96 = arith.constant 0 : index
    %c0_97 = arith.constant 0 : index
    %103 = vector.load %arg5[%c2_95, %c0_96, %c0_97] : memref<9x8x8xbf16, #tpu.memory_space<vmem>>, vector<1x8x8xbf16>
    %104 = vector.shape_cast %103 : vector<1x8x8xbf16> to vector<8x8xbf16>
    %cst_98 = arith.constant dense<0.000000e+00> : vector<256x8xf32>
    %105 = tpu.matmul %102, %104, %cst_98 {dimension_numbers = #tpu.dot_dimension_numbers<[1], [0], [0], [1], [0, 0, 1, 1], [], []>} : vector<256x8xbf16>, vector<8x8xbf16>, vector<256x8xf32> -> vector<256x8xf32>
    %106 = arith.addf %99, %105 : vector<256x8xf32>
    %c1_99 = arith.constant 1 : index
    %c0_100 = arith.constant 0 : index
    %c0_101 = arith.constant 0 : index
    %107 = vector.load %arg10[%c1_99, %c0_100, %c0_101] : memref<18x18x8xf32, #tpu.memory_space<vmem>>, vector<16x16x8xf32>
    %108 = vector.shape_cast %107 : vector<16x16x8xf32> to vector<256x8xf32>
    %109 = arith.truncf %108 : vector<256x8xf32> to vector<256x8xbf16>
    %c3_102 = arith.constant 3 : index
    %c0_103 = arith.constant 0 : index
    %c0_104 = arith.constant 0 : index
    %110 = vector.load %arg5[%c3_102, %c0_103, %c0_104] : memref<9x8x8xbf16, #tpu.memory_space<vmem>>, vector<1x8x8xbf16>
    %111 = vector.shape_cast %110 : vector<1x8x8xbf16> to vector<8x8xbf16>
    %cst_105 = arith.constant dense<0.000000e+00> : vector<256x8xf32>
    %112 = tpu.matmul %109, %111, %cst_105 {dimension_numbers = #tpu.dot_dimension_numbers<[1], [0], [0], [1], [0, 0, 1, 1], [], []>} : vector<256x8xbf16>, vector<8x8xbf16>, vector<256x8xf32> -> vector<256x8xf32>
    %113 = arith.addf %106, %112 : vector<256x8xf32>
    %c1_106 = arith.constant 1 : index
    %c1_107 = arith.constant 1 : index
    %c0_108 = arith.constant 0 : index
    %114 = vector.load %arg10[%c1_106, %c1_107, %c0_108] : memref<18x18x8xf32, #tpu.memory_space<vmem>>, vector<16x16x8xf32>
    %115 = vector.shape_cast %114 : vector<16x16x8xf32> to vector<256x8xf32>
    %116 = arith.truncf %115 : vector<256x8xf32> to vector<256x8xbf16>
    %c4_109 = arith.constant 4 : index
    %c0_110 = arith.constant 0 : index
    %c0_111 = arith.constant 0 : index
    %117 = vector.load %arg5[%c4_109, %c0_110, %c0_111] : memref<9x8x8xbf16, #tpu.memory_space<vmem>>, vector<1x8x8xbf16>
    %118 = vector.shape_cast %117 : vector<1x8x8xbf16> to vector<8x8xbf16>
    %cst_112 = arith.constant dense<0.000000e+00> : vector<256x8xf32>
    %119 = tpu.matmul %116, %118, %cst_112 {dimension_numbers = #tpu.dot_dimension_numbers<[1], [0], [0], [1], [0, 0, 1, 1], [], []>} : vector<256x8xbf16>, vector<8x8xbf16>, vector<256x8xf32> -> vector<256x8xf32>
    %120 = arith.addf %113, %119 : vector<256x8xf32>
    %c1_113 = arith.constant 1 : index
    %c2_114 = arith.constant 2 : index
    %c0_115 = arith.constant 0 : index
    %121 = vector.load %arg10[%c1_113, %c2_114, %c0_115] : memref<18x18x8xf32, #tpu.memory_space<vmem>>, vector<16x16x8xf32>
    %122 = vector.shape_cast %121 : vector<16x16x8xf32> to vector<256x8xf32>
    %123 = arith.truncf %122 : vector<256x8xf32> to vector<256x8xbf16>
    %c5_116 = arith.constant 5 : index
    %c0_117 = arith.constant 0 : index
    %c0_118 = arith.constant 0 : index
    %124 = vector.load %arg5[%c5_116, %c0_117, %c0_118] : memref<9x8x8xbf16, #tpu.memory_space<vmem>>, vector<1x8x8xbf16>
    %125 = vector.shape_cast %124 : vector<1x8x8xbf16> to vector<8x8xbf16>
    %cst_119 = arith.constant dense<0.000000e+00> : vector<256x8xf32>
    %126 = tpu.matmul %123, %125, %cst_119 {dimension_numbers = #tpu.dot_dimension_numbers<[1], [0], [0], [1], [0, 0, 1, 1], [], []>} : vector<256x8xbf16>, vector<8x8xbf16>, vector<256x8xf32> -> vector<256x8xf32>
    %127 = arith.addf %120, %126 : vector<256x8xf32>
    %c2_120 = arith.constant 2 : index
    %c0_121 = arith.constant 0 : index
    %c0_122 = arith.constant 0 : index
    %128 = vector.load %arg10[%c2_120, %c0_121, %c0_122] : memref<18x18x8xf32, #tpu.memory_space<vmem>>, vector<16x16x8xf32>
    %129 = vector.shape_cast %128 : vector<16x16x8xf32> to vector<256x8xf32>
    %130 = arith.truncf %129 : vector<256x8xf32> to vector<256x8xbf16>
    %c6_123 = arith.constant 6 : index
    %c0_124 = arith.constant 0 : index
    %c0_125 = arith.constant 0 : index
    %131 = vector.load %arg5[%c6_123, %c0_124, %c0_125] : memref<9x8x8xbf16, #tpu.memory_space<vmem>>, vector<1x8x8xbf16>
    %132 = vector.shape_cast %131 : vector<1x8x8xbf16> to vector<8x8xbf16>
    %cst_126 = arith.constant dense<0.000000e+00> : vector<256x8xf32>
    %133 = tpu.matmul %130, %132, %cst_126 {dimension_numbers = #tpu.dot_dimension_numbers<[1], [0], [0], [1], [0, 0, 1, 1], [], []>} : vector<256x8xbf16>, vector<8x8xbf16>, vector<256x8xf32> -> vector<256x8xf32>
    %134 = arith.addf %127, %133 : vector<256x8xf32>
    %c2_127 = arith.constant 2 : index
    %c1_128 = arith.constant 1 : index
    %c0_129 = arith.constant 0 : index
    %135 = vector.load %arg10[%c2_127, %c1_128, %c0_129] : memref<18x18x8xf32, #tpu.memory_space<vmem>>, vector<16x16x8xf32>
    %136 = vector.shape_cast %135 : vector<16x16x8xf32> to vector<256x8xf32>
    %137 = arith.truncf %136 : vector<256x8xf32> to vector<256x8xbf16>
    %c7_130 = arith.constant 7 : index
    %c0_131 = arith.constant 0 : index
    %c0_132 = arith.constant 0 : index
    %138 = vector.load %arg5[%c7_130, %c0_131, %c0_132] : memref<9x8x8xbf16, #tpu.memory_space<vmem>>, vector<1x8x8xbf16>
    %139 = vector.shape_cast %138 : vector<1x8x8xbf16> to vector<8x8xbf16>
    %cst_133 = arith.constant dense<0.000000e+00> : vector<256x8xf32>
    %140 = tpu.matmul %137, %139, %cst_133 {dimension_numbers = #tpu.dot_dimension_numbers<[1], [0], [0], [1], [0, 0, 1, 1], [], []>} : vector<256x8xbf16>, vector<8x8xbf16>, vector<256x8xf32> -> vector<256x8xf32>
    %141 = arith.addf %134, %140 : vector<256x8xf32>
    %c2_134 = arith.constant 2 : index
    %c2_135 = arith.constant 2 : index
    %c0_136 = arith.constant 0 : index
    %142 = vector.load %arg10[%c2_134, %c2_135, %c0_136] : memref<18x18x8xf32, #tpu.memory_space<vmem>>, vector<16x16x8xf32>
    %143 = vector.shape_cast %142 : vector<16x16x8xf32> to vector<256x8xf32>
    %144 = arith.truncf %143 : vector<256x8xf32> to vector<256x8xbf16>
    %c8_137 = arith.constant 8 : index
    %c0_138 = arith.constant 0 : index
    %c0_139 = arith.constant 0 : index
    %145 = vector.load %arg5[%c8_137, %c0_138, %c0_139] : memref<9x8x8xbf16, #tpu.memory_space<vmem>>, vector<1x8x8xbf16>
    %146 = vector.shape_cast %145 : vector<1x8x8xbf16> to vector<8x8xbf16>
    %cst_140 = arith.constant dense<0.000000e+00> : vector<256x8xf32>
    %147 = tpu.matmul %144, %146, %cst_140 {dimension_numbers = #tpu.dot_dimension_numbers<[1], [0], [0], [1], [0, 0, 1, 1], [], []>} : vector<256x8xbf16>, vector<8x8xbf16>, vector<256x8xf32> -> vector<256x8xf32>
    %148 = arith.addf %141, %147 : vector<256x8xf32>
    %c0_141 = arith.constant 0 : index
    %c0_142 = arith.constant 0 : index
    %149 = vector.load %arg6[%c0_141, %c0_142] : memref<1x8xf32, #tpu.memory_space<vmem>>, vector<1x8xf32>
    %150 = vector.shape_cast %149 : vector<1x8xf32> to vector<8xf32>
    %151 = vector.shape_cast %150 : vector<8xf32> to vector<1x8xf32>
    %152 = vector.broadcast %151 : vector<1x8xf32> to vector<256x8xf32>
    %153 = arith.mulf %148, %152 : vector<256x8xf32>
    %c0_143 = arith.constant 0 : index
    %c0_144 = arith.constant 0 : index
    %154 = vector.load %arg7[%c0_143, %c0_144] : memref<1x8xf32, #tpu.memory_space<vmem>>, vector<1x8xf32>
    %155 = vector.shape_cast %154 : vector<1x8xf32> to vector<8xf32>
    %156 = vector.shape_cast %155 : vector<8xf32> to vector<1x8xf32>
    %157 = vector.broadcast %156 : vector<1x8xf32> to vector<256x8xf32>
    %158 = arith.addf %153, %157 : vector<256x8xf32>
    %cst_145 = arith.constant 0.000000e+00 : f32
    %159 = vector.broadcast %cst_145 : f32 to vector<256x8xf32>
    %160 = arith.maximumf %158, %159 : vector<256x8xf32>
    %161 = vector.shape_cast %160 : vector<256x8xf32> to vector<16x16x8xf32>
    %c0_146 = arith.constant 0 : index
    %c0_147 = arith.constant 0 : index
    %c0_148 = arith.constant 0 : index
    %c0_149 = arith.constant 0 : index
    %162 = vector.load %arg8[%c0_146, %c0_147, %c0_148, %c0_149] : memref<1x16x16x8xf32, #tpu.memory_space<vmem>>, vector<1x16x16x8xf32>
    %163 = vector.shape_cast %162 : vector<1x16x16x8xf32> to vector<16x16x8xf32>
    %164 = vector.shape_cast %161 : vector<16x16x8xf32> to vector<1x16x16x8xf32>
    tpu.vector_store %arg8[%c0_146, %c0_147, %c0_148, %c0_149], %164 {strides = array<i32>} : memref<1x16x16x8xf32, #tpu.memory_space<vmem>>, vector<1x16x16x8xf32>,
    return
  }
  func.func @transform_0(%arg0: i32) -> (i32, i32, i32, i32) {
    %c0_i32 = arith.constant 0 : i32
    %c0_i32_0 = arith.constant 0 : i32
    %c0_i32_1 = arith.constant 0 : i32
    %c0_i32_2 = arith.constant 0 : i32
    return %arg0, %c0_i32, %c0_i32_0, %c0_i32_1 : i32, i32, i32, i32
  }
  func.func @transform_1(%arg0: i32) -> (i32, i32, i32) {
    %c0_i32 = arith.constant 0 : i32
    %c0_i32_0 = arith.constant 0 : i32
    %c0_i32_1 = arith.constant 0 : i32
    %c0_i32_2 = arith.constant 0 : i32
    return %c0_i32, %c0_i32_0, %c0_i32_1 : i32, i32, i32
  }
  func.func @transform_2(%arg0: i32) -> (i32, i32) {
    %c0_i32 = arith.constant 0 : i32
    %c0_i32_0 = arith.constant 0 : i32
    %c0_i32_1 = arith.constant 0 : i32
    return %c0_i32, %c0_i32_0 : i32, i32
  }
  func.func @transform_3(%arg0: i32) -> (i32, i32) {
    %c0_i32 = arith.constant 0 : i32
    %c0_i32_0 = arith.constant 0 : i32
    %c0_i32_1 = arith.constant 0 : i32
    return %c0_i32, %c0_i32_0 : i32, i32
  }
  func.func @transform_4(%arg0: i32) -> (i32, i32, i32) {
    %c0_i32 = arith.constant 0 : i32
    %c0_i32_0 = arith.constant 0 : i32
    %c0_i32_1 = arith.constant 0 : i32
    %c0_i32_2 = arith.constant 0 : i32
    return %c0_i32, %c0_i32_0, %c0_i32_1 : i32, i32, i32
  }
  func.func @transform_5(%arg0: i32) -> (i32, i32) {
    %c0_i32 = arith.constant 0 : i32
    %c0_i32_0 = arith.constant 0 : i32
    %c0_i32_1 = arith.constant 0 : i32
    return %c0_i32, %c0_i32_0 : i32, i32
  }
  func.func @transform_6(%arg0: i32) -> (i32, i32) {
    %c0_i32 = arith.constant 0 : i32
    %c0_i32_0 = arith.constant 0 : i32
    %c0_i32_1 = arith.constant 0 : i32
    return %c0_i32, %c0_i32_0 : i32, i32
  }
  func.func @transform_7(%arg0: i32) -> (i32, i32, i32, i32) {
    %c0_i32 = arith.constant 0 : i32
    %c0_i32_0 = arith.constant 0 : i32
    %c0_i32_1 = arith.constant 0 : i32
    %c0_i32_2 = arith.constant 0 : i32
    return %arg0, %c0_i32, %c0_i32_0, %c0_i32_1 : i32, i32, i32, i32
  }
}

</mosaic_0001>

<bundles_post_ra>
// kernel: conv_relu_forward.1
= control target key start
LH: loop header
LB: loop body
LE: loop exit
PB: predicated region body
PF: predicated region fallthrough
CT: control target
= control target key end

     0   :  { %s7790_s24 = smov 0   ;;  %s9200_s0 = inlined_call_operand.vmem [shape: f32[2,16,16,4], index: 0, kind: input, shape index: {}]   ;;  %s9201_s1 = inlined_call_operand.vmem [shape: bf16[9,4,8], index: 1, kind: input, shape index: {}]   ;;  %s9202_s2 = inlined_call_operand.vmem [shape: f32[1,8], index: 2, kind: input, shape index: {}]   ;;  %s9203_s3 = inlined_call_operand.vmem [shape: f32[1,8], index: 3, kind: input, shape index: {}]   ;;  %s9204_s4 = inlined_call_operand.vmem [shape: bf16[9,8,8], index: 4, kind: input, shape index: {}]   ;;  %s9205_s5 = inlined_call_operand.vmem [shape: f32[1,8], index: 5, kind: input, shape index: {}]   ;;  %s9206_s6 = inlined_call_operand.vmem [shape: f32[1,8], index: 6, kind: input, shape index: {}]   ;;  %s9207_s7 = inlined_call_operand.vmem [shape: f32[2,16,16,8], index: 7, kind: output, shape index: {}]  }
   0x1 LB: > { %s5963_s25 = sadd.s32 4294967295, %s7747_s24   ;;  %p5967_p0 = scmp.ge.s32.totalorder %s7747_s24, 1  ;;  %s7747_s24 = sphi %s7790_s24, %s17_s24  }
   0x2   : > { %p237_p1 = scmp.lt.s32.totalorder %s7747_s24, 3 }
   0x4   : > { %p238_p2 = pnand %p5967_p0, %p237_p1 }
   0x5   : > { %v5972_v0 = vld [vmem:[%s9201_s1 + $0x2] sm:$0x3] (!%p238_p2)  ;;  %vm548_vm0 = vcmask (!%p238_p2), 1041408   ;;  %vm280_vm1 = vcmask (!%p238_p2), 31744   ;;  %vm283_vm2 = vcmask (!%p238_p2), 25600   ;;  %v7749_v2 = vmov (!%p238_p2), 0.0  }
   0x6   : > { %241 = sbr.rel (%p238_p2) target bundleno = 1576 (0x628), region = 48  ;;  %7714 = vmatprep.subr.msk.bf16.mxu0 (!%p238_p2), %vm548_vm0, %v5972_v0  ;;  %v550_v1 = vsel (!%p238_p2), %vm548_vm0, %v5972_v0, 0  ;;  %281 = vst.msk [vmem:[#allocation2] sm:$0xff] (!%p238_p2), %vm280_vm1, %v7749_v2  ;;  %282 = vst.msk [vmem:[#allocation2 + $0x8] sm:$0xff] (!%p238_p2), %vm280_vm1, %v7749_v2  ;;  %v449_v3 = vld [vmem:[%s9201_s1] sm:$0x3] (!%p238_p2) }
   0x7   : > { %284 = vst.msk [vmem:[#allocation2 + $0x10] sm:$0x3] (!%p238_p2), %vm283_vm2, %v7749_v2  ;;  %287 = vst.msk [vmem:[#allocation2 + $0x28] sm:$0x3] (!%p238_p2), %vm283_vm2, %v7749_v2  ;;  %p269_p3 = scmp.lt.s32.totalorder (!%p238_p2), %s5963_s25, 1  ;;  %6591 = vmatpush3.bf16.msra.mxu0 (!%p238_p2), %v550_v1  ;;  %v762_v33 = vsel (!%p238_p2), %vm548_vm0, %v449_v3, 0 }
   0x8   : > { %285 = vst.msk [vmem:[#allocation2 + $0x18] sm:$0xff] (!%p238_p2), %vm280_vm1, %v7749_v2  ;;  %286 = vst.msk [vmem:[#allocation2 + $0x20] sm:$0xff] (!%p238_p2), %vm280_vm1, %v7749_v2  ;;  %7715 = vmatprep.subr.msk.bf16.mxu0 (!%p238_p2), %vm548_vm0, %v449_v3  ;;  %v7986_v38 = vld [vmem:[%s9201_s1 + $0x4] sm:$0x3] (!%p238_p2)  ;;  %vm3094_vm3 = vcmask (!%p238_p2), 64512   ;;  %vm3097_vm4 = vcmask (!%p238_p2), 58368  }
   0x9   : > { %288 = vst.msk [vmem:[#allocation2 + $0x30] sm:$0xff] (!%p238_p2), %vm280_vm1, %v7749_v2  ;;  %289 = vst.msk [vmem:[#allocation2 + $0x38] sm:$0xff] (!%p238_p2), %vm280_vm1, %v7749_v2  ;;  %vm3330_vm5 = vcmask (!%p238_p2), 1043456  }
   0xa   : > { %290 = vst.msk [vmem:[#allocation2 + $0x40] sm:$0x3] (!%p238_p2), %vm283_vm2, %v7749_v2  ;;  %293 = vst.msk [vmem:[#allocation2 + $0x58] sm:$0x3] (!%p238_p2), %vm283_vm2, %v7749_v2 }
   0xb   : > { %291 = vst.msk [vmem:[#allocation2 + $0x48] sm:$0xff] (!%p238_p2), %vm280_vm1, %v7749_v2  ;;  %292 = vst.msk [vmem:[#allocation2 + $0x50] sm:$0xff] (!%p238_p2), %vm280_vm1, %v7749_v2 }
   0xc   : > { %294 = vst.msk [vmem:[#allocation2 + $0x60] sm:$0xff] (!%p238_p2), %vm280_vm1, %v7749_v2  ;;  %295 = vst.msk [vmem:[#allocation2 + $0x68] sm:$0xff] (!%p238_p2), %vm280_vm1, %v7749_v2 }
   0xd   : > { %296 = vst.msk [vmem:[#allocation2 + $0x70] sm:$0x3] %vm283_vm2, %v7749_v2  ;;  %299 = vst.msk [vmem:[#allocation2 + $0x88] sm:$0x3] %vm283_vm2, %v7749_v2  ;;  %s9209_s25 = smov (!%p269_p3, %s5963_s25), 1  ;;  %v450_v7 = vld [vmem:[#allocation2 + $0x1] sm:$0xff] }
   0xe   : > { %297 = vst.msk [vmem:[#allocation2 + $0x78] sm:$0xff] %vm280_vm1, %v7749_v2  ;;  %298 = vst.msk [vmem:[#allocation2 + $0x80] sm:$0xff] %vm280_vm1, %v7749_v2  ;;  %s6282_s30 = sshll.u32 %s9209_s25, 8  ;;  %v451_v8 = vld [vmem:[#allocation2 + $0x9] sm:$0xff] }
   0xf   : > { %300 = vst.msk [vmem:[#allocation2 + $0x90] sm:$0xff] %vm280_vm1, %v7749_v2  ;;  %301 = vst.msk [vmem:[#allocation2 + $0x98] sm:$0xff] %vm280_vm1, %v7749_v2  ;;  %s7927_s10 = scalar_lea.vmem %s9200_s0, %s6282_s30  ;;  %v482_v10 = vpack.c.bf16 %v451_v8, %v450_v7  ;;  %s9071_s13 = scalar_lea.vmem %s9207_s7, %s6282_s30 }
  0x10   : > { %302 = vst.msk [vmem:[#allocation2 + $0xa0] sm:$0x3] %vm283_vm2, %v7749_v2  ;;  %305 = vst.msk [vmem:[#allocation2 + $0xb8] sm:$0x3] %vm283_vm2, %v7749_v2  ;;  %v336_v4 = vld [vmem:[%s7927_s10] sm:$0xff]  ;;  %v337_v5 = vld [vmem:[%s7927_s10 + $0x8] sm:$0xff] }
  0x11   : > { %303 = vst.msk [vmem:[#allocation2 + $0xa8] sm:$0xff] %vm280_vm1, %v7749_v2  ;;  %304 = vst.msk [vmem:[#allocation2 + $0xb0] sm:$0xff] %vm280_vm1, %v7749_v2  ;;  %v338_v6 = vld [vmem:[%s7927_s10 + $0x10] sm:$0xff]  ;;  %v339_v9 = vld [vmem:[%s7927_s10 + $0x18] sm:$0xff]  ;;  %6592 = vmatprep.mubr.msk.bf16.mxu0 %vm280_vm1, %v482_v10 }
  0x12   : > { %306 = vst.msk [vmem:[#allocation2 + $0xc0] sm:$0xff] %vm280_vm1, %v7749_v2  ;;  %307 = vst.msk [vmem:[#allocation2 + $0xc8] sm:$0xff] %vm280_vm1, %v7749_v2  ;;  %v340_v11 = vld [vmem:[%s7927_s10 + $0x20] sm:$0xff]  ;;  %v341_v12 = vld [vmem:[%s7927_s10 + $0x28] sm:$0xff] }
  0x13   : > { %308 = vst.msk [vmem:[#allocation2 + $0xd0] sm:$0x3] %vm283_vm2, %v7749_v2  ;;  %311 = vst.msk [vmem:[#allocation2 + $0xe8] sm:$0x3] %vm283_vm2, %v7749_v2  ;;  %v342_v13 = vld [vmem:[%s7927_s10 + $0x30] sm:$0xff]  ;;  %v343_v14 = vld [vmem:[%s7927_s10 + $0x38] sm:$0xff] }
  0x14   : > { %309 = vst.msk [vmem:[#allocation2 + $0xd8] sm:$0xff] %vm280_vm1, %v7749_v2  ;;  %310 = vst.msk [vmem:[#allocation2 + $0xe0] sm:$0xff] %vm280_vm1, %v7749_v2  ;;  %v344_v15 = vld [vmem:[%s7927_s10 + $0x40] sm:$0xff]  ;;  %v345_v16 = vld [vmem:[%s7927_s10 + $0x48] sm:$0xff] }
  0x15   : > { %312 = vst.msk [vmem:[#allocation2 + $0xf0] sm:$0xff] %vm280_vm1, %v7749_v2  ;;  %313 = vst.msk [vmem:[#allocation2 + $0xf8] sm:$0xff] %vm280_vm1, %v7749_v2  ;;  %v346_v17 = vld [vmem:[%s7927_s10 + $0x50] sm:$0xff]  ;;  %v347_v18 = vld [vmem:[%s7927_s10 + $0x58] sm:$0xff] }
  0x16   : > { %314 = vst.msk [vmem:[#allocation2 + $0x100] sm:$0x3] %vm283_vm2, %v7749_v2  ;;  %317 = vst.msk [vmem:[#allocation2 + $0x118] sm:$0x3] %vm283_vm2, %v7749_v2  ;;  %v348_v19 = vld [vmem:[%s7927_s10 + $0x60] sm:$0xff]  ;;  %v349_v20 = vld [vmem:[%s7927_s10 + $0x68] sm:$0xff] }
  0x17   : > { %315 = vst.msk [vmem:[#allocation2 + $0x108] sm:$0xff] %vm280_vm1, %v7749_v2  ;;  %316 = vst.msk [vmem:[#allocation2 + $0x110] sm:$0xff] %vm280_vm1, %v7749_v2  ;;  %v350_v21 = vld [vmem:[%s7927_s10 + $0x70] sm:$0xff]  ;;  %v351_v22 = vld [vmem:[%s7927_s10 + $0x78] sm:$0xff] }
  0x18   : > { %318 = vst.msk [vmem:[#allocation2 + $0x120] sm:$0xff] %vm280_vm1, %v7749_v2  ;;  %319 = vst.msk [vmem:[#allocation2 + $0x128] sm:$0xff] %vm280_vm1, %v7749_v2  ;;  %v352_v23 = vld [vmem:[%s7927_s10 + $0x80] sm:$0xff]  ;;  %v353_v24 = vld [vmem:[%s7927_s10 + $0x88] sm:$0xff] }
  0x19   : > { %320 = vst.msk [vmem:[#allocation2 + $0x130] sm:$0x3] %vm283_vm2, %v7749_v2  ;;  %323 = vst.msk [vmem:[#allocation2 + $0x148] sm:$0x3] %vm283_vm2, %v7749_v2  ;;  %v354_v25 = vld [vmem:[%s7927_s10 + $0x90] sm:$0xff]  ;;  %v355_v26 = vld [vmem:[%s7927_s10 + $0x98] sm:$0xff] }
  0x1a   : > { %321 = vst.msk [vmem:[#allocation2 + $0x138] sm:$0xff] %vm280_vm1, %v7749_v2  ;;  %322 = vst.msk [vmem:[#allocation2 + $0x140] sm:$0xff] %vm280_vm1, %v7749_v2  ;;  %v356_v27 = vld [vmem:[%s7927_s10 + $0xa0] sm:$0xff]  ;;  %v357_v28 = vld [vmem:[%s7927_s10 + $0xa8] sm:$0xff] }
  0x1b   : > { %324 = vst.msk [vmem:[#allocation2 + $0x150] sm:$0xff] %vm280_vm1, %v7749_v2  ;;  %325 = vst.msk [vmem:[#allocation2 + $0x158] sm:$0xff] %vm280_vm1, %v7749_v2  ;;  %v358_v35 = vld [vmem:[%s7927_s10 + $0xb0] sm:$0xff]  ;;  %v359_v36 = vld [vmem:[%s7927_s10 + $0xb8] sm:$0xff] }
  0x1c   : > { %326 = vst.msk [vmem:[#allocation2 + $0x160] sm:$0x3] %vm283_vm2, %v7749_v2  ;;  %329 = vst.msk [vmem:[#allocation2 + $0x178] sm:$0x3] %vm283_vm2, %v7749_v2  ;;  %v360_v45 = vld [vmem:[%s7927_s10 + $0xc0] sm:$0xff]  ;;  %v361_v46 = vld [vmem:[%s7927_s10 + $0xc8] sm:$0xff] }
  0x1d   : > { %327 = vst.msk [vmem:[#allocation2 + $0x168] sm:$0xff] %vm280_vm1, %v7749_v2  ;;  %328 = vst.msk [vmem:[#allocation2 + $0x170] sm:$0xff] %vm280_vm1, %v7749_v2  ;;  %v362_v47 = vld [vmem:[%s7927_s10 + $0xd0] sm:$0xff]  ;;  %v363_v48 = vld [vmem:[%s7927_s10 + $0xd8] sm:$0xff] }
  0x1e   : > { %330 = vst.msk [vmem:[#allocation2 + $0x180] sm:$0xff] %vm280_vm1, %v7749_v2  ;;  %331 = vst.msk [vmem:[#allocation2 + $0x188] sm:$0xff] %vm280_vm1, %v7749_v2  ;;  %v364_v49 = vld [vmem:[%s7927_s10 + $0xe0] sm:$0xff]  ;;  %v365_v50 = vld [vmem:[%s7927_s10 + $0xe8] sm:$0xff] }
  0x1f   : > { %332 = vst.msk [vmem:[#allocation2 + $0x190] sm:$0x3] %vm283_vm2, %v7749_v2  ;;  %335 = vst.msk [vmem:[#allocation2 + $0x1a8] sm:$0x3] %vm283_vm2, %v7749_v2 }
  0x20   : > { %333 = vst.msk [vmem:[#allocation2 + $0x198] sm:$0xff] %vm280_vm1, %v7749_v2  ;;  %334 = vst.msk [vmem:[#allocation2 + $0x1a0] sm:$0xff] %vm280_vm1, %v7749_v2 }
  0x21   : > { %369 = vst.msk [vmem:[#allocation2 + $0x19] sm:$0xff] %vm280_vm1, %v336_v4  ;;  %370 = vst.msk [vmem:[#allocation2 + $0x21] sm:$0xff] %vm280_vm1, %v337_v5 }
  0x22   : > { %371 = vst.msk [vmem:[#allocation2 + $0x31] sm:$0xff] %vm280_vm1, %v338_v6  ;;  %372 = vst.msk [vmem:[#allocation2 + $0x39] sm:$0xff] %vm280_vm1, %v339_v9 }
  0x23   : > { %373 = vst.msk [vmem:[#allocation2 + $0x49] sm:$0xff] %vm280_vm1, %v340_v11  ;;  %374 = vst.msk [vmem:[#allocation2 + $0x51] sm:$0xff] %vm280_vm1, %v341_v12 }
  0x24   : > { %375 = vst.msk [vmem:[#allocation2 + $0x61] sm:$0xff] %vm280_vm1, %v342_v13  ;;  %376 = vst.msk [vmem:[#allocation2 + $0x69] sm:$0xff] %vm280_vm1, %v343_v14 }
  0x25   : > { %377 = vst.msk [vmem:[#allocation2 + $0x79] sm:$0xff] %vm280_vm1, %v344_v15  ;;  %378 = vst.msk [vmem:[#allocation2 + $0x81] sm:$0xff] %vm280_vm1, %v345_v16 }
  0x26   : > { %379 = vst.msk [vmem:[#allocation2 + $0x91] sm:$0xff] %vm280_vm1, %v346_v17  ;;  %380 = vst.msk [vmem:[#allocation2 + $0x99] sm:$0xff] %vm280_vm1, %v347_v18 }
  0x27   : > { %381 = vst.msk [vmem:[#allocation2 + $0xa9] sm:$0xff] %vm280_vm1, %v348_v19  ;;  %382 = vst.msk [vmem:[#allocation2 + $0xb1] sm:$0xff] %vm280_vm1, %v349_v20  ;;  %v401_v20 = vld [vmem:[#allocation2] sm:$0xff] }
  0x28   : > { %383 = vst.msk [vmem:[#allocation2 + $0xc1] sm:$0xff] %vm280_vm1, %v350_v21  ;;  %384 = vst.msk [vmem:[#allocation2 + $0xc9] sm:$0xff] %vm280_vm1, %v351_v22  ;;  %v452_v29 = vld [vmem:[#allocation2 + $0x19] sm:$0xff]  ;;  %v453_v30 = vld [vmem:[#allocation2 + $0x21] sm:$0xff] }
  0x29   : > { %385 = vst.msk [vmem:[#allocation2 + $0xd9] sm:$0xff] %vm280_vm1, %v352_v23  ;;  %386 = vst.msk [vmem:[#allocation2 + $0xe1] sm:$0xff] %vm280_vm1, %v353_v24  ;;  %v454_v31 = vld [vmem:[#allocation2 + $0x31] sm:$0xff]  ;;  %v7974_v32 = vpack.c.bf16 %v453_v30, %v452_v29  ;;  %v455_v34 = vld [vmem:[#allocation2 + $0x39] sm:$0xff]  ;;  %v1024_v30 = vsel %vm548_vm0, %v7986_v38, 0 }
  0x2a   : > { %387 = vst.msk [vmem:[#allocation2 + $0xf1] sm:$0xff] %vm280_vm1, %v354_v25  ;;  %388 = vst.msk [vmem:[#allocation2 + $0xf9] sm:$0xff] %vm280_vm1, %v355_v26  ;;  %v7979_v37 = vpack.c.bf16 %v455_v34, %v454_v31  ;;  %v456_v39 = vld [vmem:[#allocation2 + $0x49] sm:$0xff]  ;;  %v457_v40 = vld [vmem:[#allocation2 + $0x51] sm:$0xff] }
  0x2b   : > { %389 = vst.msk [vmem:[#allocation2 + $0x109] sm:$0xff] %vm280_vm1, %v356_v27  ;;  %390 = vst.msk [vmem:[#allocation2 + $0x111] sm:$0xff] %vm280_vm1, %v357_v28  ;;  %6593 = vmatmul.mubr.msk.bf16.vlgmr.msra.gmra.mrb[0].mxu0 %vm280_vm1, %v7974_v32  ;;  %v458_v41 = vld [vmem:[#allocation2 + $0x61] sm:$0xff]  ;;  %v459_v42 = vld [vmem:[#allocation2 + $0x69] sm:$0xff]  ;;  %v7994_v43 = vpack.c.bf16 %v457_v40, %v456_v39 }
  0x2c   : > { %391 = vst.msk [vmem:[#allocation2 + $0x121] sm:$0xff] %vm280_vm1, %v358_v35  ;;  %392 = vst.msk [vmem:[#allocation2 + $0x129] sm:$0xff] %vm280_vm1, %v359_v36  ;;  %6625 = vmatpush3.bf16.msra.mxu0 %v762_v33  ;;  %6596 = vmatprep.mubr.msk.bf16.mxu0 %vm280_vm1, %v7979_v37  ;;  %v7996_v44 = vpack.c.bf16 %v459_v42, %v458_v41  ;;  %v460_v51 = vld [vmem:[#allocation2 + $0x79] sm:$0xff]  ;;  %v461_v52 = vld [vmem:[#allocation2 + $0x81] sm:$0xff] }
  0x2d   : > { %7716 = vmatprep.subr.msk.bf16.mxu0 %vm548_vm0, %v7986_v38  ;;  %393 = vst.msk [vmem:[#allocation2 + $0x139] sm:$0xff] %vm280_vm1, %v360_v45  ;;  %394 = vst.msk [vmem:[#allocation2 + $0x141] sm:$0xff] %vm280_vm1, %v361_v46  ;;  %v462_v53 = vld [vmem:[#allocation2 + $0x91] sm:$0xff]  ;;  %v463_v54 = vld [vmem:[#allocation2 + $0x99] sm:$0xff]  ;;  %v8014_v55 = vpack.c.bf16 %v461_v52, %v460_v51 }
  0x2e   : > { %395 = vst.msk [vmem:[#allocation2 + $0x151] sm:$0xff] %vm280_vm1, %v362_v47  ;;  %396 = vst.msk [vmem:[#allocation2 + $0x159] sm:$0xff] %vm280_vm1, %v363_v48  ;;  %v8016_v56 = vpack.c.bf16 %v463_v54, %v462_v53  ;;  %v464_v57 = vld [vmem:[#allocation2 + $0xa9] sm:$0xff]  ;;  %v465_v58 = vld [vmem:[#allocation2 + $0xb1] sm:$0xff] }
  0x2f   : > { %397 = vst.msk [vmem:[#allocation2 + $0x169] sm:$0xff] %vm280_vm1, %v364_v49  ;;  %398 = vst.msk [vmem:[#allocation2 + $0x171] sm:$0xff] %vm280_vm1, %v365_v50  ;;  %v466_v59 = vld [vmem:[#allocation2 + $0xc1] sm:$0xff]  ;;  %v467_v60 = vld [vmem:[#allocation2 + $0xc9] sm:$0xff]  ;;  %v8022_v61 = vpack.c.bf16 %v465_v58, %v464_v57 }
  0x30   : > { %v8024_v62 = vpack.c.bf16 %v467_v60, %v466_v59  ;;  %v468_v63 = vld [vmem:[#allocation2 + $0xd9] sm:$0xff]  ;;  %v469_v0 = vld [vmem:[#allocation2 + $0xe1] sm:$0xff]  ;;  %v405_v26 = vld [vmem:[#allocation2 + $0x30] sm:$0xff]  ;;  %3102 = vst.msk [vmem:[#allocation3 + $0x30] sm:$0xff] %vm3094_vm3, %v7749_v2 }
  0x31   : > { %v470_v1 = vld [vmem:[#allocation2 + $0xf1] sm:$0xff]  ;;  %v471_v3 = vld [vmem:[#allocation2 + $0xf9] sm:$0xff]  ;;  %v8030_v4 = vpack.c.bf16 %v469_v0, %v468_v63  ;;  %v402_v21 = vld [vmem:[#allocation2 + $0x8] sm:$0xff]  ;;  %3103 = vst.msk [vmem:[#allocation3 + $0x38] sm:$0xff] %vm3094_vm3, %v7749_v2 }
  0x32   : > { %v8032_v5 = vpack.c.bf16 %v471_v3, %v470_v1  ;;  %v472_v6 = vld [vmem:[#allocation2 + $0x109] sm:$0xff]  ;;  %v473_v7 = vld [vmem:[#allocation2 + $0x111] sm:$0xff]  ;;  %v433_v23 = vpack.c.bf16 %v402_v21, %v401_v20  ;;  %v404_v25 = vld [vmem:[#allocation2 + $0x20] sm:$0xff]  ;;  %3095 = vst.msk [vmem:[#allocation3] sm:$0xff] %vm3094_vm3, %v7749_v2 }
  0x33   : > { %6597 = vmatmul.mubr.msk.bf16.gmra.mrb[4].mxu0 %vm280_vm1, %v7994_v43  ;;  %v474_v8 = vld [vmem:[#allocation2 + $0x121] sm:$0xff]  ;;  %v475_v9 = vld [vmem:[#allocation2 + $0x129] sm:$0xff]  ;;  %v8038_v10 = vpack.c.bf16 %v473_v7, %v472_v6  ;;  %v403_v24 = vld [vmem:[#allocation2 + $0x18] sm:$0xff]  ;;  %3096 = vst.msk [vmem:[#allocation3 + $0x8] sm:$0xff] %vm3094_vm3, %v7749_v2 }
  0x34   : > { %6600 = vmatprep.mubr.msk.bf16.mxu0 %vm280_vm1, %v7996_v44  ;;  %v8040_v11 = vpack.c.bf16 %v475_v9, %v474_v8  ;;  %v476_v12 = vld [vmem:[#allocation2 + $0x139] sm:$0xff]  ;;  %v477_v13 = vld [vmem:[#allocation2 + $0x141] sm:$0xff]  ;;  %v8059_v28 = vpack.c.bf16 %v404_v25, %v403_v24  ;;  %v408_v34 = vld [vmem:[#allocation2 + $0x50] sm:$0xff]  ;;  %3099 = vst.msk [vmem:[#allocation3 + $0x18] sm:$0xff] %vm3094_vm3, %v7749_v2 }
  0x35   : > { %v478_v14 = vld [vmem:[#allocation2 + $0x151] sm:$0xff]  ;;  %v479_v15 = vld [vmem:[#allocation2 + $0x159] sm:$0xff]  ;;  %v8046_v16 = vpack.c.bf16 %v477_v13, %v476_v12  ;;  %v8068_v31 = vld [vmem:[%s9201_s1 + $0x6] sm:$0x3]  ;;  %3100 = vst.msk [vmem:[#allocation3 + $0x20] sm:$0xff] %vm3094_vm3, %v7749_v2 }
  0x36   : > { %v8048_v17 = vpack.c.bf16 %v479_v15, %v478_v14  ;;  %v480_v18 = vld [vmem:[#allocation2 + $0x169] sm:$0xff]  ;;  %v481_v19 = vld [vmem:[#allocation2 + $0x171] sm:$0xff]  ;;  %v409_v35 = vld [vmem:[#allocation2 + $0x60] sm:$0xff]  ;;  %3105 = vst.msk [vmem:[#allocation3 + $0x48] sm:$0xff] %vm3094_vm3, %v7749_v2 }
  0x37   : > { %v8054_v22 = vpack.c.bf16 %v481_v19, %v480_v18  ;;  %v406_v27 = vld [vmem:[#allocation2 + $0x38] sm:$0xff]  ;;  %v407_v33 = vld [vmem:[#allocation2 + $0x48] sm:$0xff]  ;;  %v412_v41 = vld [vmem:[#allocation2 + $0x80] sm:$0xff]  ;;  %3106 = vst.msk [vmem:[#allocation3 + $0x50] sm:$0xff] %vm3094_vm3, %v7749_v2 }
  0x38   : > { %v8061_v29 = vpack.c.bf16 %v406_v27, %v405_v26  ;;  %v410_v36 = vld [vmem:[#allocation2 + $0x68] sm:$0xff]  ;;  %v8076_v38 = vpack.c.bf16 %v408_v34, %v407_v33  ;;  %v411_v40 = vld [vmem:[#allocation2 + $0x78] sm:$0xff]  ;;  %v413_v42 = vld [vmem:[#allocation2 + $0x90] sm:$0xff]  ;;  %3108 = vst.msk [vmem:[#allocation3 + $0x60] sm:$0xff] %vm3094_vm3, %v7749_v2 }
  0x39   : > { %v8078_v39 = vpack.c.bf16 %v410_v36, %v409_v35  ;;  %v414_v45 = vld [vmem:[#allocation2 + $0x98] sm:$0xff]  ;;  %v8084_v46 = vpack.c.bf16 %v412_v41, %v411_v40  ;;  %v415_v48 = vld [vmem:[#allocation2 + $0xa8] sm:$0xff]  ;;  %v416_v49 = vld [vmem:[#allocation2 + $0xb0] sm:$0xff]  ;;  %v1318_v41 = vsel %vm548_vm0, %v8068_v31, 0  ;;  %3109 = vst.msk [vmem:[#allocation3 + $0x68] sm:$0xff] %vm3094_vm3, %v7749_v2 }
  0x3a   : > { %v8086_v47 = vpack.c.bf16 %v414_v45, %v413_v42  ;;  %v417_v50 = vld [vmem:[#allocation2 + $0xc0] sm:$0xff]  ;;  %v418_v51 = vld [vmem:[#allocation2 + $0xc8] sm:$0xff]  ;;  %v8092_v52 = vpack.c.bf16 %v416_v49, %v415_v48  ;;  %v419_v54 = vld [vmem:[#allocation2 + $0xd8] sm:$0xff]  ;;  %3111 = vst.msk [vmem:[#allocation3 + $0x78] sm:$0xff] %vm3094_vm3, %v7749_v2 }
  0x3b   : > { %6601 = vmatmul.mubr.msk.bf16.gmra.mrb[8].mxu0 %vm280_vm1, %v8014_v55  ;;  %v8094_v53 = vpack.c.bf16 %v418_v51, %v417_v50  ;;  %v420_v57 = vld [vmem:[#allocation2 + $0xe0] sm:$0xff]  ;;  %v421_v58 = vld [vmem:[#allocation2 + $0xf0] sm:$0xff]  ;;  %v422_v59 = vld [vmem:[#allocation2 + $0xf8] sm:$0xff]  ;;  %3112 = vst.msk [vmem:[#allocation3 + $0x80] sm:$0xff] %vm3094_vm3, %v7749_v2 }
  0x3c   : > { %6604 = vmatprep.mubr.msk.bf16.mxu0 %vm280_vm1, %v8016_v56  ;;  %v8100_v60 = vpack.c.bf16 %v420_v57, %v419_v54  ;;  %v8102_v63 = vpack.c.bf16 %v422_v59, %v421_v58  ;;  %v423_v0 = vld [vmem:[#allocation2 + $0x108] sm:$0xff]  ;;  %v424_v1 = vld [vmem:[#allocation2 + $0x110] sm:$0xff]  ;;  %v425_v3 = vld [vmem:[#allocation2 + $0x120] sm:$0xff]  ;;  %3114 = vst.msk [vmem:[#allocation3 + $0x90] sm:$0xff] %vm3094_vm3, %v7749_v2 }
  0x3d   : > { %v426_v6 = vld [vmem:[#allocation2 + $0x128] sm:$0xff]  ;;  %v8108_v7 = vpack.c.bf16 %v424_v1, %v423_v0  ;;  %v427_v9 = vld [vmem:[#allocation2 + $0x138] sm:$0xff]  ;;  %v428_v12 = vld [vmem:[#allocation2 + $0x140] sm:$0xff]  ;;  %3115 = vst.msk [vmem:[#allocation3 + $0x98] sm:$0xff] %vm3094_vm3, %v7749_v2 }
  0x3e   : > { %v8110_v8 = vpack.c.bf16 %v426_v6, %v425_v3  ;;  %v429_v13 = vld [vmem:[#allocation2 + $0x150] sm:$0xff]  ;;  %v430_v14 = vld [vmem:[#allocation2 + $0x158] sm:$0xff]  ;;  %v8116_v15 = vpack.c.bf16 %v428_v12, %v427_v9  ;;  %v431_v21 = vld [vmem:[#allocation2 + $0x168] sm:$0xff]  ;;  %3117 = vst.msk [vmem:[#allocation3 + $0xa8] sm:$0xff] %vm3094_vm3, %v7749_v2 }
  0x3f   : > { %v8118_v18 = vpack.c.bf16 %v430_v14, %v429_v13  ;;  %v366_v19 = vld [vmem:[%s7927_s10 + $0xf0] sm:$0xff]  ;;  %v367_v20 = vld [vmem:[%s7927_s10 + $0xf8] sm:$0xff]  ;;  %v925_v24 = vld [vmem:[#allocation2 + $0x2] sm:$0xff]  ;;  %3118 = vst.msk [vmem:[#allocation3 + $0xb0] sm:$0xff] %vm3094_vm3, %v7749_v2 }
  0x40   : > { %399 = vst.msk [vmem:[#allocation2 + $0x181] sm:$0xff] %vm280_vm1, %v366_v19  ;;  %400 = vst.msk [vmem:[#allocation2 + $0x189] sm:$0xff] %vm280_vm1, %v367_v20  ;;  %v926_v25 = vld [vmem:[#allocation2 + $0xa] sm:$0xff]  ;;  %v928_v33 = vld [vmem:[#allocation2 + $0x22] sm:$0xff] }
  0x41   : > { %v957_v27 = vpack.c.bf16 %v926_v25, %v925_v24  ;;  %v929_v34 = vld [vmem:[#allocation2 + $0x32] sm:$0xff]  ;;  %v930_v35 = vld [vmem:[#allocation2 + $0x3a] sm:$0xff]  ;;  %v6039_v42 = vld [vmem:[%s9201_s1 + $0x8] sm:$0x3]  ;;  %3120 = vst.msk [vmem:[#allocation3 + $0xc0] sm:$0xff] %vm3094_vm3, %v7749_v2 }
  0x42   : > { %v8135_v40 = vpack.c.bf16 %v930_v35, %v929_v34  ;;  %v931_v45 = vld [vmem:[#allocation2 + $0x4a] sm:$0xff]  ;;  %v932_v48 = vld [vmem:[#allocation2 + $0x52] sm:$0xff]  ;;  %v933_v49 = vld [vmem:[#allocation2 + $0x62] sm:$0xff]  ;;  %3121 = vst.msk [vmem:[#allocation3 + $0xc8] sm:$0xff] %vm3094_vm3, %v7749_v2 }
  0x43   : > { %6605 = vmatmul.mubr.msk.bf16.gmra.mrb[12].mxu0 %vm280_vm1, %v8022_v61  ;;  %v934_v50 = vld [vmem:[#allocation2 + $0x6a] sm:$0xff]  ;;  %v8147_v51 = vpack.c.bf16 %v932_v48, %v931_v45  ;;  %v935_v54 = vld [vmem:[#allocation2 + $0x7a] sm:$0xff]  ;;  %v936_v57 = vld [vmem:[#allocation2 + $0x82] sm:$0xff]  ;;  %3123 = vst.msk [vmem:[#allocation3 + $0xd8] sm:$0xff] %vm3094_vm3, %v7749_v2 }
  0x44   : > { %6608 = vmatprep.mubr.msk.bf16.mxu0 %vm280_vm1, %v8024_v62  ;;  %v937_v58 = vld [vmem:[#allocation2 + $0x92] sm:$0xff]  ;;  %v938_v59 = vld [vmem:[#allocation2 + $0x9a] sm:$0xff]  ;;  %v8155_v0 = vpack.c.bf16 %v936_v57, %v935_v54  ;;  %v939_v3 = vld [vmem:[#allocation2 + $0xaa] sm:$0xff]  ;;  %3124 = vst.msk [vmem:[#allocation3 + $0xe0] sm:$0xff] %vm3094_vm3, %v7749_v2 }
  0x45   : > { %v8157_v1 = vpack.c.bf16 %v938_v59, %v937_v58  ;;  %v940_v6 = vld [vmem:[#allocation2 + $0xb2] sm:$0xff]  ;;  %v941_v9 = vld [vmem:[#allocation2 + $0xc2] sm:$0xff]  ;;  %v942_v12 = vld [vmem:[#allocation2 + $0xca] sm:$0xff]  ;;  %3126 = vst.msk [vmem:[#allocation3 + $0xf0] sm:$0xff] %vm3094_vm3, %v7749_v2 }
  0x46   : > { %v8163_v13 = vpack.c.bf16 %v940_v6, %v939_v3  ;;  %v8165_v14 = vpack.c.bf16 %v942_v12, %v941_v9  ;;  %v943_v19 = vld [vmem:[#allocation2 + $0xda] sm:$0xff]  ;;  %v944_v20 = vld [vmem:[#allocation2 + $0xe2] sm:$0xff]  ;;  %v950_v34 = vld [vmem:[#allocation2 + $0x12a] sm:$0xff]  ;;  %v1612_v6 = vsel %vm548_vm0, %v6039_v42, 0  ;;  %3127 = vst.msk [vmem:[#allocation3 + $0xf8] sm:$0xff] %vm3094_vm3, %v7749_v2 }
  0x47   : > { %v8171_v24 = vpack.c.bf16 %v944_v20, %v943_v19  ;;  %v951_v45 = vld [vmem:[#allocation2 + $0x13a] sm:$0xff]  ;;  %v952_v48 = vld [vmem:[#allocation2 + $0x142] sm:$0xff]  ;;  %v955_v58 = vld [vmem:[#allocation2 + $0x16a] sm:$0xff]  ;;  %3129 = vst.msk [vmem:[#allocation3 + $0x108] sm:$0xff] %vm3094_vm3, %v7749_v2 }
  0x48   : > { %v8187_v54 = vpack.c.bf16 %v952_v48, %v951_v45  ;;  %v956_v59 = vld [vmem:[#allocation2 + $0x172] sm:$0xff]  ;;  %v6056_v9 = vld [vmem:[%s9201_s1 + $0xa] sm:$0x3]  ;;  %v6073_v20 = vld [vmem:[%s9201_s1 + $0xc] sm:$0x3]  ;;  %3130 = vst.msk [vmem:[#allocation3 + $0x110] sm:$0xff] %vm3094_vm3, %v7749_v2 }
  0x49   : > { %v8195_v3 = vpack.c.bf16 %v956_v59, %v955_v58  ;;  %v1906_v19 = vsel %vm548_vm0, %v6056_v9, 0  ;;  %3132 = vst.msk [vmem:[#allocation3 + $0x120] sm:$0xff] %vm3094_vm3, %v7749_v2  ;;  %3133 = vst.msk [vmem:[#allocation3 + $0x128] sm:$0xff] %vm3094_vm3, %v7749_v2 }
  0x4a   : > { %3135 = vst.msk [vmem:[#allocation3 + $0x138] sm:$0xff] %vm3094_vm3, %v7749_v2  ;;  %3136 = vst.msk [vmem:[#allocation3 + $0x140] sm:$0xff] %vm3094_vm3, %v7749_v2 }
  0x4b   : > { %6609 = vmatmul.mubr.msk.bf16.gmra.mrb[16].mxu0 %vm280_vm1, %v8030_v4  ;;  %3138 = vst.msk [vmem:[#allocation3 + $0x150] sm:$0xff] %vm3094_vm3, %v7749_v2  ;;  %3139 = vst.msk [vmem:[#allocation3 + $0x158] sm:$0xff] %vm3094_vm3, %v7749_v2 }
  0x4c   : > { %6612 = vmatprep.mubr.msk.bf16.mxu0 %vm280_vm1, %v8032_v5  ;;  %3141 = vst.msk [vmem:[#allocation3 + $0x168] sm:$0xff] %vm3094_vm3, %v7749_v2  ;;  %3142 = vst.msk [vmem:[#allocation3 + $0x170] sm:$0xff] %vm3094_vm3, %v7749_v2 }
  0x4d   : > { %3144 = vst.msk [vmem:[#allocation3 + $0x180] sm:$0xff] %vm3094_vm3, %v7749_v2  ;;  %3145 = vst.msk [vmem:[#allocation3 + $0x188] sm:$0xff] %vm3094_vm3, %v7749_v2 }
  0x4e   : > { %3147 = vst.msk [vmem:[#allocation3 + $0x198] sm:$0xff] %vm3094_vm3, %v7749_v2  ;;  %3148 = vst.msk [vmem:[#allocation3 + $0x1a0] sm:$0xff] %vm3094_vm3, %v7749_v2 }
  0x4f   : > { %3104 = vst.msk [vmem:[#allocation3 + $0x40] sm:$0x3] %vm3097_vm4, %v7749_v2  ;;  %3098 = vst.msk [vmem:[#allocation3 + $0x10] sm:$0x3] %vm3097_vm4, %v7749_v2 }
  0x50   : > { %3101 = vst.msk [vmem:[#allocation3 + $0x28] sm:$0x3] %vm3097_vm4, %v7749_v2  ;;  %3107 = vst.msk [vmem:[#allocation3 + $0x58] sm:$0x3] %vm3097_vm4, %v7749_v2 }
  0x51   : > { %3110 = vst.msk [vmem:[#allocation3 + $0x70] sm:$0x3] %vm3097_vm4, %v7749_v2  ;;  %3113 = vst.msk [vmem:[#allocation3 + $0x88] sm:$0x3] %vm3097_vm4, %v7749_v2 }
  0x52   : > { %3116 = vst.msk [vmem:[#allocation3 + $0xa0] sm:$0x3] %vm3097_vm4, %v7749_v2  ;;  %3119 = vst.msk [vmem:[#allocation3 + $0xb8] sm:$0x3] %vm3097_vm4, %v7749_v2 }
  0x53   : > { %6613 = vmatmul.mubr.msk.bf16.gmra.mrb[20].mxu0 %vm280_vm1, %v8038_v10  ;;  %3122 = vst.msk [vmem:[#allocation3 + $0xd0] sm:$0x3] %vm3097_vm4, %v7749_v2  ;;  %3125 = vst.msk [vmem:[#allocation3 + $0xe8] sm:$0x3] %vm3097_vm4, %v7749_v2 }
  0x54   : > { %6616 = vmatprep.mubr.msk.bf16.mxu0 %vm280_vm1, %v8040_v11  ;;  %3128 = vst.msk [vmem:[#allocation3 + $0x100] sm:$0x3] %vm3097_vm4, %v7749_v2  ;;  %3131 = vst.msk [vmem:[#allocation3 + $0x118] sm:$0x3] %vm3097_vm4, %v7749_v2 }
  0x55   : > { %3134 = vst.msk [vmem:[#allocation3 + $0x130] sm:$0x3] %vm3097_vm4, %v7749_v2  ;;  %3137 = vst.msk [vmem:[#allocation3 + $0x148] sm:$0x3] %vm3097_vm4, %v7749_v2 }
  0x56   : > { %3140 = vst.msk [vmem:[#allocation3 + $0x160] sm:$0x3] %vm3097_vm4, %v7749_v2  ;;  %3143 = vst.msk [vmem:[#allocation3 + $0x178] sm:$0x3] %vm3097_vm4, %v7749_v2 }
  0x57   : > { %3146 = vst.msk [vmem:[#allocation3 + $0x190] sm:$0x3] %vm3097_vm4, %v7749_v2  ;;  %3149 = vst.msk [vmem:[#allocation3 + $0x1a8] sm:$0x3] %vm3097_vm4, %v7749_v2  ;;  %v8533_v2 = vld [vmem:[%s9202_s2] ss:$0 sm:$0xff] }
  0x5b   : > { %6617 = vmatmul.mubr.msk.bf16.gmra.mrb[24].mxu0 %vm280_vm1, %v8046_v16 }
  0x5c   : > { %6620 = vmatprep.mubr.msk.bf16.mxu0 %vm280_vm1, %v8048_v17 }
  0x63   : > { %6621 = vmatmul.mubr.msk.bf16.gmra.mrb[28].mxu0 %vm280_vm1, %v8054_v22 }
  0x64   : > { %6626 = vmatprep.mubr.msk.bf16.mxu0 %vm280_vm1, %v433_v23  ;;  %v432_v23 = vld [vmem:[#allocation2 + $0x170] sm:$0xff] }
  0x65   : > { %v8128_v26 = vpack.c.bf16 %v432_v23, %v431_v21  ;;  %v945_v21 = vld [vmem:[#allocation2 + $0xf2] sm:$0xff]  ;;  %v946_v23 = vld [vmem:[#allocation2 + $0xfa] sm:$0xff] }
  0x66   : > { %v8173_v25 = vpack.c.bf16 %v946_v23, %v945_v21  ;;  %v6090_v21 = vld [vmem:[%s9201_s1 + $0xe] sm:$0x3] }
  0x67   : > { %v1838_v23 = vld [vmem:[#allocation2 + $0x18a] sm:$0xff] }
  0x6b   : > { %6627 = vmatmul.mubr.msk.bf16.vlgmr.msra.gmra.mrb[0].mxu0 %vm280_vm1, %v8059_v28 }
  0x6c   : > { %6659 = vmatpush3.bf16.msra.mxu0 %v1024_v30  ;;  %6630 = vmatprep.mubr.msk.bf16.mxu0 %vm280_vm1, %v8061_v29  ;;  %v927_v30 = vld [vmem:[#allocation2 + $0x1a] sm:$0xff] }
  0x6d   : > { %7717 = vmatprep.subr.msk.bf16.mxu0 %vm548_vm0, %v8068_v31  ;;  %v8133_v36 = vpack.c.bf16 %v928_v33, %v927_v30  ;;  %v8149_v31 = vpack.c.bf16 %v934_v50, %v933_v49  ;;  %v948_v30 = vld [vmem:[#allocation2 + $0x112] sm:$0xff]  ;;  %v949_v33 = vld [vmem:[#allocation2 + $0x122] sm:$0xff]  ;;  %v954_v50 = vld [vmem:[#allocation2 + $0x15a] sm:$0xff] }
  0x6e   : > { %v953_v49 = vld [vmem:[#allocation2 + $0x152] sm:$0xff] }
  0x6f   : > { %v8189_v57 = vpack.c.bf16 %v954_v50, %v953_v49 }
  0x73   : > { %6631 = vmatmul.mubr.msk.bf16.gmra.mrb[4].mxu0 %vm280_vm1, %v8076_v38 }
  0x74   : > { %6634 = vmatprep.mubr.msk.bf16.mxu0 %vm280_vm1, %v8078_v39 }
  0x7b   : > { %6635 = vmatmul.mubr.msk.bf16.gmra.mrb[8].mxu0 %vm280_vm1, %v8084_v46 }
  0x7c   : > { %6638 = vmatprep.mubr.msk.bf16.mxu0 %vm280_vm1, %v8086_v47 }
  0x83   : > { %6639 = vmatmul.mubr.msk.bf16.gmra.mrb[12].mxu0 %vm280_vm1, %v8092_v52 }
  0x84   : > { %6642 = vmatprep.mubr.msk.bf16.mxu0 %vm280_vm1, %v8094_v53 }
  0x8b   : > { %6643 = vmatmul.mubr.msk.bf16.gmra.mrb[16].mxu0 %vm280_vm1, %v8100_v60 }
  0x8c   : > { %6646 = vmatprep.mubr.msk.bf16.mxu0 %vm280_vm1, %v8102_v63 }
  0x93   : > { %6647 = vmatmul.mubr.msk.bf16.gmra.mrb[20].mxu0 %vm280_vm1, %v8108_v7 }
  0x94   : > { %6650 = vmatprep.mubr.msk.bf16.mxu0 %vm280_vm1, %v8110_v8 }
  0x9b   : > { %6651 = vmatmul.mubr.msk.bf16.gmra.mrb[24].mxu0 %vm280_vm1, %v8116_v15 }
  0x9c   : > { %6654 = vmatprep.mubr.msk.bf16.mxu0 %vm280_vm1, %v8118_v18 }
  0xa3   : > { %6655 = vmatmul.mubr.msk.bf16.gmra.mrb[28].mxu0 %vm280_vm1, %v8128_v26 }
  0xa4   : > { %6660 = vmatprep.mubr.msk.bf16.mxu0 %vm280_vm1, %v957_v27  ;;  %v947_v27 = vld [vmem:[#allocation2 + $0x10a] sm:$0xff] }
  0xa5   : > { %v8179_v35 = vpack.c.bf16 %v948_v30, %v947_v27  ;;  %v2495_v30 = vsel %vm548_vm0, %v6090_v21, 0 }
  0xab   : > { %6661 = vmatmul.mubr.msk.bf16.vlgmr.msra.gmra.mrb[0].mxu0 %vm280_vm1, %v8133_v36 }
  0xac   : > { %6693 = vmatpush3.bf16.msra.mxu0 %v1318_v41  ;;  %6664 = vmatprep.mubr.msk.bf16.mxu0 %vm280_vm1, %v8135_v40  ;;  %v8181_v41 = vpack.c.bf16 %v950_v34, %v949_v33  ;;  %v6107_v33 = vld [vmem:[%s9201_s1 + $0x10] sm:$0x3] }
  0xad   : > { %7718 = vmatprep.subr.msk.bf16.mxu0 %vm548_vm0, %v6039_v42  ;;  %v1250_v42 = vld [vmem:[#allocation2 + $0x188] sm:$0xff] }
  0xb3   : > { %6665 = vmatmul.mubr.msk.bf16.gmra.mrb[4].mxu0 %vm280_vm1, %v8147_v51 }
  0xb4   : > { %6668 = vmatprep.mubr.msk.bf16.mxu0 %vm280_vm1, %v8149_v31 }
  0xbb   : > { %6669 = vmatmul.mubr.msk.bf16.gmra.mrb[8].mxu0 %vm280_vm1, %v8155_v0 }
  0xbc   : > { %6672 = vmatprep.mubr.msk.bf16.mxu0 %vm280_vm1, %v8157_v1 }
  0xc3   : > { %6673 = vmatmul.mubr.msk.bf16.gmra.mrb[12].mxu0 %vm280_vm1, %v8163_v13 }
  0xc4   : > { %6676 = vmatprep.mubr.msk.bf16.mxu0 %vm280_vm1, %v8165_v14 }
  0xcb   : > { %6677 = vmatmul.mubr.msk.bf16.gmra.mrb[16].mxu0 %vm280_vm1, %v8171_v24 }
  0xcc   : > { %6680 = vmatprep.mubr.msk.bf16.mxu0 %vm280_vm1, %v8173_v25 }
  0xd3   : > { %6681 = vmatmul.mubr.msk.bf16.gmra.mrb[20].mxu0 %vm280_vm1, %v8179_v35 }
  0xd4   : > { %6684 = vmatprep.mubr.msk.bf16.mxu0 %vm280_vm1, %v8181_v41 }
  0xdb   : > { %6685 = vmatmul.mubr.msk.bf16.gmra.mrb[24].mxu0 %vm280_vm1, %v8187_v54 }
  0xdc   : > { %6688 = vmatprep.mubr.msk.bf16.mxu0 %vm280_vm1, %v8189_v57 }
  0xe3   : > { %6689 = vmatmul.mubr.msk.bf16.gmra.mrb[28].mxu0 %vm280_vm1, %v8195_v3 }
  0xe4   : > { %6694 = vmatprep.mubr.msk.bf16.mxu0 %vm280_vm1, %v8059_v28  ;;  %v1249_v28 = vld [vmem:[#allocation2 + $0x180] sm:$0xff] }
  0xe5   : > { %v8234_v12 = vpack.c.bf16 %v1250_v42, %v1249_v28 }
  0xeb   : > { %6695 = vmatmul.mubr.msk.bf16.vlgmr.msra.gmra.mrb[0].mxu0 %vm280_vm1, %v8061_v29 }
  0xec   : > { %6727 = vmatpush3.bf16.msra.mxu0 %v1612_v6  ;;  %6698 = vmatprep.mubr.msk.bf16.mxu0 %vm280_vm1, %v8076_v38 }
  0xed   : > { %7719 = vmatprep.subr.msk.bf16.mxu0 %vm548_vm0, %v6056_v9 }
  0xf3   : > { %6699 = vmatmul.mubr.msk.bf16.gmra.mrb[4].mxu0 %vm280_vm1, %v8078_v39 }
  0xf4   : > { %6702 = vmatprep.mubr.msk.bf16.mxu0 %vm280_vm1, %v8084_v46 }
  0xfb   : > { %6703 = vmatmul.mubr.msk.bf16.gmra.mrb[8].mxu0 %vm280_vm1, %v8086_v47 }
  0xfc   : > { %6706 = vmatprep.mubr.msk.bf16.mxu0 %vm280_vm1, %v8092_v52 }
 0x103   : > { %6707 = vmatmul.mubr.msk.bf16.gmra.mrb[12].mxu0 %vm280_vm1, %v8094_v53 }
 0x104   : > { %6710 = vmatprep.mubr.msk.bf16.mxu0 %vm280_vm1, %v8100_v60 }
 0x10b   : > { %6711 = vmatmul.mubr.msk.bf16.gmra.mrb[16].mxu0 %vm280_vm1, %v8102_v63 }
 0x10c   : > { %6714 = vmatprep.mubr.msk.bf16.mxu0 %vm280_vm1, %v8108_v7 }
 0x113   : > { %6715 = vmatmul.mubr.msk.bf16.gmra.mrb[20].mxu0 %vm280_vm1, %v8110_v8 }
 0x114   : > { %6718 = vmatprep.mubr.msk.bf16.mxu0 %vm280_vm1, %v8116_v15 }
 0x11b   : > { %6719 = vmatmul.mubr.msk.bf16.gmra.mrb[24].mxu0 %vm280_vm1, %v8118_v18 }
 0x11c   : > { %6722 = vmatprep.mubr.msk.bf16.mxu0 %vm280_vm1, %v8128_v26 }
 0x123   : > { %6723 = vmatmul.mubr.msk.bf16.gmra.mrb[28].mxu0 %vm280_vm1, %v8234_v12 }
 0x124   : > { %6728 = vmatprep.mubr.msk.bf16.mxu0 %vm280_vm1, %v7974_v32  ;;  %v1543_v32 = vld [vmem:[#allocation2 + $0x181] sm:$0xff] }
 0x12b   : > { %6729 = vmatmul.mubr.msk.bf16.vlgmr.msra.gmra.mrb[0].mxu0 %vm280_vm1, %v7979_v37  ;;  %v1544_v37 = vld [vmem:[#allocation2 + $0x189] sm:$0xff] }
 0x12c   : > { %6761 = vmatpush3.bf16.msra.mxu0 %v1906_v19  ;;  %6732 = vmatprep.mubr.msk.bf16.mxu0 %vm280_vm1, %v7994_v43  ;;  %v8273_v43 = vpack.c.bf16 %v1544_v37, %v1543_v32 }
 0x12d   : > { %7720 = vmatprep.subr.msk.bf16.mxu0 %vm548_vm0, %v6073_v20 }
 0x133   : > { %6733 = vmatmul.mubr.msk.bf16.gmra.mrb[4].mxu0 %vm280_vm1, %v7996_v44  ;;  %v2201_v44 = vsel %vm548_vm0, %v6073_v20, 0 }
 0x134   : > { %6736 = vmatprep.mubr.msk.bf16.mxu0 %vm280_vm1, %v8014_v55 }
 0x13b   : > { %6737 = vmatmul.mubr.msk.bf16.gmra.mrb[8].mxu0 %vm280_vm1, %v8016_v56 }
 0x13c   : > { %6740 = vmatprep.mubr.msk.bf16.mxu0 %vm280_vm1, %v8022_v61 }
 0x143   : > { %6741 = vmatmul.mubr.msk.bf16.gmra.mrb[12].mxu0 %vm280_vm1, %v8024_v62 }
 0x144   : > { %6744 = vmatprep.mubr.msk.bf16.mxu0 %vm280_vm1, %v8030_v4 }
 0x14b   : > { %6745 = vmatmul.mubr.msk.bf16.gmra.mrb[16].mxu0 %vm280_vm1, %v8032_v5 }
 0x14c   : > { %6748 = vmatprep.mubr.msk.bf16.mxu0 %vm280_vm1, %v8038_v10 }
 0x153   : > { %6749 = vmatmul.mubr.msk.bf16.gmra.mrb[20].mxu0 %vm280_vm1, %v8040_v11 }
 0x154   : > { %6752 = vmatprep.mubr.msk.bf16.mxu0 %vm280_vm1, %v8046_v16 }
 0x15b   : > { %6753 = vmatmul.mubr.msk.bf16.gmra.mrb[24].mxu0 %vm280_vm1, %v8048_v17 }
 0x15c   : > { %6756 = vmatprep.mubr.msk.bf16.mxu0 %vm280_vm1, %v8054_v22 }
 0x163   : > { %6757 = vmatmul.mubr.msk.bf16.gmra.mrb[28].mxu0 %vm280_vm1, %v8273_v43 }
 0x164   : > { %6762 = vmatprep.mubr.msk.bf16.mxu0 %vm280_vm1, %v8133_v36  ;;  %v1837_v36 = vld [vmem:[#allocation2 + $0x182] sm:$0xff] }
 0x165   : > { %v8312_v27 = vpack.c.bf16 %v1838_v23, %v1837_v36 }
 0x16b   : > { %6763 = vmatmul.mubr.msk.bf16.vlgmr.msra.gmra.mrb[0].mxu0 %vm280_vm1, %v8135_v40 }
 0x16c   : > { %6795 = vmatpush3.bf16.msra.mxu0 %v2201_v44  ;;  %6766 = vmatprep.mubr.msk.bf16.mxu0 %vm280_vm1, %v8147_v51 }
 0x16d   : > { %7721 = vmatprep.subr.msk.bf16.mxu0 %vm548_vm0, %v6090_v21 }
 0x173   : > { %6767 = vmatmul.mubr.msk.bf16.gmra.mrb[4].mxu0 %vm280_vm1, %v8149_v31 }
 0x174   : > { %6770 = vmatprep.mubr.msk.bf16.mxu0 %vm280_vm1, %v8155_v0 }
 0x17b   : > { %6771 = vmatmul.mubr.msk.bf16.gmra.mrb[8].mxu0 %vm280_vm1, %v8157_v1 }
 0x17c   : > { %6774 = vmatprep.mubr.msk.bf16.mxu0 %vm280_vm1, %v8163_v13 }
 0x183   : > { %6775 = vmatmul.mubr.msk.bf16.gmra.mrb[12].mxu0 %vm280_vm1, %v8165_v14 }
 0x184   : > { %6778 = vmatprep.mubr.msk.bf16.mxu0 %vm280_vm1, %v8171_v24 }
 0x18b   : > { %6779 = vmatmul.mubr.msk.bf16.gmra.mrb[16].mxu0 %vm280_vm1, %v8173_v25 }
 0x18c   : > { %6782 = vmatprep.mubr.msk.bf16.mxu0 %vm280_vm1, %v8179_v35 }
 0x193   : > { %6783 = vmatmul.mubr.msk.bf16.gmra.mrb[20].mxu0 %vm280_vm1, %v8181_v41 }
 0x194   : > { %6786 = vmatprep.mubr.msk.bf16.mxu0 %vm280_vm1, %v8187_v54 }
 0x19b   : > { %6787 = vmatmul.mubr.msk.bf16.gmra.mrb[24].mxu0 %vm280_vm1, %v8189_v57 }
 0x19c   : > { %6790 = vmatprep.mubr.msk.bf16.mxu0 %vm280_vm1, %v8195_v3 }
 0x1a3   : > { %6791 = vmatmul.mubr.msk.bf16.gmra.mrb[28].mxu0 %vm280_vm1, %v8312_v27 }
 0x1a4   : > { %6796 = vmatprep.mubr.msk.bf16.mxu0 %vm280_vm1, %v8061_v29  ;;  %v2132_v29 = vld [vmem:[#allocation2 + $0x198] sm:$0xff] }
 0x1ab   : > { %6797 = vmatmul.mubr.msk.bf16.vlgmr.msra.gmra.mrb[0].mxu0 %vm280_vm1, %v8076_v38  ;;  %v2133_v38 = vld [vmem:[#allocation2 + $0x1a0] sm:$0xff] }
 0x1ac   : > { %6829 = vmatpush3.bf16.msra.mxu0 %v2495_v30  ;;  %6800 = vmatprep.mubr.msk.bf16.mxu0 %vm280_vm1, %v8078_v39  ;;  %v2396_v39 = vld [vmem:[#allocation2 + $0x31] sm:$0xff] }
 0x1ad   : > { %7722 = vmatprep.subr.msk.bf16.mxu0 %vm548_vm0, %v6107_v33 }
 0x1b3   : > { %6801 = vmatmul.mubr.msk.bf16.gmra.mrb[4].mxu0 %vm280_vm1, %v8084_v46  ;;  %v2397_v46 = vld [vmem:[#allocation2 + $0x39] sm:$0xff] }
 0x1b4   : > { %6804 = vmatprep.mubr.msk.bf16.mxu0 %vm280_vm1, %v8086_v47  ;;  %v2149_v47 = vpack.c.bf16 %v2133_v38, %v2132_v29 }
 0x1bb   : > { %6805 = vmatmul.mubr.msk.bf16.gmra.mrb[8].mxu0 %vm280_vm1, %v8092_v52  ;;  %v2428_v52 = vpack.c.bf16 %v2397_v46, %v2396_v39 }
 0x1bc   : > { %6808 = vmatprep.mubr.msk.bf16.mxu0 %vm280_vm1, %v8094_v53  ;;  %v2398_v53 = vld [vmem:[#allocation2 + $0x49] sm:$0xff] }
 0x1c3   : > { %6809 = vmatmul.mubr.msk.bf16.gmra.mrb[12].mxu0 %vm280_vm1, %v8100_v60  ;;  %v2399_v60 = vld [vmem:[#allocation2 + $0x51] sm:$0xff] }
 0x1c4   : > { %6812 = vmatprep.mubr.msk.bf16.mxu0 %vm280_vm1, %v8102_v63  ;;  %v2400_v63 = vld [vmem:[#allocation2 + $0x61] sm:$0xff] }
 0x1cb   : > { %6813 = vmatmul.mubr.msk.bf16.gmra.mrb[16].mxu0 %vm280_vm1, %v8108_v7  ;;  %v2401_v7 = vld [vmem:[#allocation2 + $0x69] sm:$0xff] }
 0x1cc   : > { %6816 = vmatprep.mubr.msk.bf16.mxu0 %vm280_vm1, %v8110_v8  ;;  %v2429_v8 = vpack.c.bf16 %v2399_v60, %v2398_v53 }
 0x1d3   : > { %6817 = vmatmul.mubr.msk.bf16.gmra.mrb[20].mxu0 %vm280_vm1, %v8116_v15  ;;  %v2430_v15 = vpack.c.bf16 %v2401_v7, %v2400_v63 }
 0x1d4   : > { %6820 = vmatprep.mubr.msk.bf16.mxu0 %vm280_vm1, %v8118_v18  ;;  %v2789_v18 = vsel %vm548_vm0, %v6107_v33, 0 }
 0x1db   : > { %6821 = vmatmul.mubr.msk.bf16.gmra.mrb[24].mxu0 %vm280_vm1, %v8128_v26  ;;  %v3231_v26 = vld [vmem:[%s9204_s4] sm:$0xf] }
 0x1dc   : > { %6824 = vmatprep.mubr.msk.bf16.mxu0 %vm280_vm1, %v8234_v12 }
 0x1e3   : > { %6825 = vmatmul.mubr.msk.bf16.gmra.mrb[28].mxu0 %vm280_vm1, %v2149_v47  ;;  %v3544_v47 = vsel %vm3330_vm5, %v3231_v26, 0 }
 0x1e4   : > { %6830 = vmatprep.mubr.msk.bf16.mxu0 %vm280_vm1, %v2428_v52 }
 0x1eb   : > { %6831 = vmatmul.mubr.msk.bf16.vlgmr.msra.gmra.mrb[0].mxu0 %vm280_vm1, %v2429_v8  ;;  %v8576_v8 = vld [vmem:[%s9204_s4 + $0x8] sm:$0xf] }
 0x1ec   : > { %6863 = vmatpush3.bf16.msra.mxu0 %v2789_v18  ;;  %6834 = vmatprep.mubr.msk.bf16.mxu0 %vm280_vm1, %v2430_v15 }
 0x1f3   : > { %6835 = vmatmul.mubr.msk.bf16.gmra.mrb[4].mxu0 %vm280_vm1, %v8014_v55  ;;  %v2426_v55 = vld [vmem:[#allocation2 + $0x199] sm:$0xff] }
 0x1f4   : > { %6838 = vmatprep.mubr.msk.bf16.mxu0 %vm280_vm1, %v8016_v56  ;;  %v2427_v56 = vld [vmem:[#allocation2 + $0x1a1] sm:$0xff] }
 0x1fb   : > { %6839 = vmatmul.mubr.msk.bf16.gmra.mrb[8].mxu0 %vm280_vm1, %v8022_v61  ;;  %v2443_v61 = vpack.c.bf16 %v2427_v56, %v2426_v55 }
 0x1fc   : > { %6842 = vmatprep.mubr.msk.bf16.mxu0 %vm280_vm1, %v8024_v62  ;;  %v2720_v62 = vld [vmem:[#allocation2 + $0x19a] sm:$0xff] }
 0x203   : > { %6843 = vmatmul.mubr.msk.bf16.gmra.mrb[12].mxu0 %vm280_vm1, %v8030_v4  ;;  %v2721_v4 = vld [vmem:[#allocation2 + $0x1a2] sm:$0xff] }
 0x204   : > { %6846 = vmatprep.mubr.msk.bf16.mxu0 %vm280_vm1, %v8032_v5  ;;  %v2737_v5 = vpack.c.bf16 %v2721_v4, %v2720_v62 }
 0x20b   : > { %6847 = vmatmul.mubr.msk.bf16.gmra.mrb[16].mxu0 %vm280_vm1, %v8038_v10  ;;  %v6126_v10 = vld [vmem:[%s9204_s4 + $0x4] sm:$0xf] }
 0x20c   : > { %6850 = vmatprep.mubr.msk.bf16.mxu0 %vm280_vm1, %v8040_v11  ;;  %7723 = vmatprep.subr.msk.bf16.mxu1 %vm3330_vm5, %v6126_v10  ;;  %v3332_v11 = vsel %vm3330_vm5, %v6126_v10, 0 }
 0x20d   : > { %6897 = vmatpush3.bf16.msra.mxu1 %v3332_v11 }
 0x20e   : > { %7724 = vmatprep.subr.msk.bf16.mxu1 %vm3330_vm5, %v3231_v26 }
 0x213   : > { %6851 = vmatmul.mubr.msk.bf16.gmra.mrb[20].mxu0 %vm280_vm1, %v8046_v16  ;;  %v3232_v16 = vld [vmem:[#allocation3 + $0x1] sm:$0xff] }
 0x214   : > { %6854 = vmatprep.mubr.msk.bf16.mxu0 %vm280_vm1, %v8048_v17  ;;  %v3233_v17 = vld [vmem:[#allocation3 + $0x9] sm:$0xff] }
 0x21b   : > { %6855 = vmatmul.mubr.msk.bf16.gmra.mrb[24].mxu0 %vm280_vm1, %v8054_v22  ;;  %v3264_v22 = vpack.c.bf16 %v3233_v17, %v3232_v16 }
 0x21c   : > { %6858 = vmatprep.mubr.msk.bf16.mxu0 %vm280_vm1, %v8273_v43 }
 0x21d   : > { %6898 = vmatprep.mubr.msk.bf16.mxu1 %vm3094_vm3, %v3264_v22 }
 0x223   : > { %6859 = vmatmul.mubr.msk.bf16.gmra.mrb[28].mxu0 %vm280_vm1, %v2443_v61 }
 0x224   : > { %6864 = vmatprep.mubr.msk.bf16.mxu0 %vm280_vm1, %v8135_v40 }
 0x22b   : > { %6865 = vmatmul.mubr.msk.bf16.vlgmr.msra.gmra.mrb[0].mxu0 %vm280_vm1, %v8147_v51  ;;  %v8538_v51 = vld [vmem:[%s9203_s3] ss:$0 sm:$0xff] }
 0x22c   : > { %6868 = vmatprep.mubr.msk.bf16.mxu0 %vm280_vm1, %v8149_v31 }
 0x233   : > { %6869 = vmatmul.mubr.msk.bf16.gmra.mrb[4].mxu0 %vm280_vm1, %v8155_v0 }
 0x234   : > { %6872 = vmatprep.mubr.msk.bf16.mxu0 %vm280_vm1, %v8157_v1 }
 0x23b   : > { %6873 = vmatmul.mubr.msk.bf16.gmra.mrb[8].mxu0 %vm280_vm1, %v8163_v13 }
 0x23c   : > { %6876 = vmatprep.mubr.msk.bf16.mxu0 %vm280_vm1, %v8165_v14 }
 0x243   : > { %6877 = vmatmul.mubr.msk.bf16.gmra.mrb[12].mxu0 %vm280_vm1, %v8171_v24 }
 0x244   : > { %6880 = vmatprep.mubr.msk.bf16.mxu0 %vm280_vm1, %v8173_v25 }
 0x24b   : > { %6881 = vmatmul.mubr.msk.bf16.gmra.mrb[16].mxu0 %vm280_vm1, %v8179_v35 }
 0x24c   : > { %6884 = vmatprep.mubr.msk.bf16.mxu0 %vm280_vm1, %v8181_v41 }
 0x253   : > { %6885 = vmatmul.mubr.msk.bf16.gmra.mrb[20].mxu0 %vm280_vm1, %v8187_v54 }
 0x254   : > { %6888 = vmatprep.mubr.msk.bf16.mxu0 %vm280_vm1, %v8189_v57 }
 0x25b   : > { %6889 = vmatmul.mubr.msk.bf16.gmra.mrb[24].mxu0 %vm280_vm1, %v8195_v3 }
 0x25c   : > { %6892 = vmatprep.mubr.msk.bf16.mxu0 %vm280_vm1, %v8312_v27 }
 0x263   : > { %6893 = vmatmul.mubr.msk.bf16.gmra.mrb[28].mxu0 %vm280_vm1, %v2737_v5 }
 0x2fe   : > { %v6866_v40 = vpop.f32.mrb[0].mxu0 }
 0x2ff   : > { %v2993_v31 = vmul.f32 %v6866_v40, %v8533_v2  ;;  %v2825_v0 = vpop.f32.mrb[1].mxu0 }
 0x300   : > { %v2991_v1 = vmul.f32 %v8533_v2, %v2825_v0  ;;  %v6867_v13 = vpop.f32.mrb[2].mxu0 }
 0x301   : > { %v3032_v14 = vadd.f32 %v8538_v51, %v2993_v31  ;;  %v2994_v24 = vmul.f32 %v6867_v13, %v8533_v2  ;;  %v2828_v25 = vpop.f32.mrb[3].mxu0 }
 0x302   : > { %v3030_v34 = vadd.f32 %v8538_v51, %v2991_v1  ;;  %v2992_v35 = vmul.f32 %v8533_v2, %v2828_v25 }
 0x303   : > { %v3064_v41 = vmax.f32 %v3032_v14, 0.0  ;;  %v3033_v45 = vadd.f32 %v8538_v51, %v2994_v24 }
 0x304   : > { %v3062_v48 = vmax.f32 %v3030_v34, 0.0  ;;  %v3031_v49 = vadd.f32 %v8538_v51, %v2992_v35 }
 0x305   : > { %3153 = vst.msk [vmem:[#allocation3 + $0x31] sm:$0xff] %vm3094_vm3, %v3064_v41  ;;  %v3065_v50 = vmax.f32 %v3033_v45, 0.0 }
 0x306   : > { %3151 = vst.msk [vmem:[#allocation3 + $0x19] sm:$0xff] %vm3094_vm3, %v3062_v48  ;;  %v3063_v54 = vmax.f32 %v3031_v49, 0.0  ;;  %v6870_v57 = vpop.f32.mrb[4].mxu0 }
 0x307   : > { %3154 = vst.msk [vmem:[#allocation3 + $0x39] sm:$0xff] %vm3094_vm3, %v3065_v50  ;;  %v2997_v58 = vmul.f32 %v6870_v57, %v8533_v2  ;;  %v2841_v59 = vpop.f32.mrb[5].mxu0 }
 0x308   : > { %3152 = vst.msk [vmem:[#allocation3 + $0x21] sm:$0xff] %vm3094_vm3, %v3063_v54  ;;  %v2995_v3 = vmul.f32 %v8533_v2, %v2841_v59  ;;  %v6871_v6 = vpop.f32.mrb[6].mxu0 }
 0x309   : > { %v3036_v9 = vadd.f32 %v8538_v51, %v2997_v58  ;;  %v2998_v28 = vmul.f32 %v6871_v6, %v8533_v2  ;;  %v2844_v42 = vpop.f32.mrb[7].mxu0 }
 0x30a   : > { %v3034_v12 = vadd.f32 %v8538_v51, %v2995_v3  ;;  %v2996_v19 = vmul.f32 %v8533_v2, %v2844_v42 }
 0x30b   : > { %v3068_v20 = vmax.f32 %v3036_v9, 0.0  ;;  %v3037_v32 = vadd.f32 %v8538_v51, %v2998_v28 }
 0x30c   : > { %v3066_v37 = vmax.f32 %v3034_v12, 0.0  ;;  %v3035_v43 = vadd.f32 %v8538_v51, %v2996_v19  ;;  %v3236_v52 = vld [vmem:[#allocation3 + $0x31] sm:$0xff] }
 0x30d   : > { %3157 = vst.msk [vmem:[#allocation3 + $0x61] sm:$0xff] %vm3094_vm3, %v3068_v20  ;;  %v3069_v44 = vmax.f32 %v3037_v32, 0.0  ;;  %v3234_v33 = vld [vmem:[#allocation3 + $0x19] sm:$0xff] }
 0x30e   : > { %3155 = vst.msk [vmem:[#allocation3 + $0x49] sm:$0xff] %vm3094_vm3, %v3066_v37  ;;  %v3067_v21 = vmax.f32 %v3035_v43, 0.0  ;;  %v6874_v36 = vpop.f32.mrb[8].mxu0  ;;  %v3237_v23 = vld [vmem:[#allocation3 + $0x39] sm:$0xff] }
 0x30f   : > { %3158 = vst.msk [vmem:[#allocation3 + $0x69] sm:$0xff] %vm3094_vm3, %v3069_v44  ;;  %v3001_v27 = vmul.f32 %v6874_v36, %v8533_v2  ;;  %v2857_v30 = vpop.f32.mrb[9].mxu0  ;;  %v3235_v29 = vld [vmem:[#allocation3 + $0x21] sm:$0xff]  ;;  %v8571_v7 = vpack.c.bf16 %v3237_v23, %v3236_v52 }
 0x310   : > { %3156 = vst.msk [vmem:[#allocation3 + $0x51] sm:$0xff] %vm3094_vm3, %v3067_v21  ;;  %v2999_v38 = vmul.f32 %v8533_v2, %v2857_v30  ;;  %v6875_v39 = vpop.f32.mrb[10].mxu0  ;;  %v8566_v46 = vpack.c.bf16 %v3235_v29, %v3234_v33 }
 0x311   : > { %v3040_v53 = vadd.f32 %v8538_v51, %v3001_v27  ;;  %v3002_v60 = vmul.f32 %v6875_v39, %v8533_v2  ;;  %v2860_v63 = vpop.f32.mrb[11].mxu0 }
 0x312   : > { %v3038_v15 = vadd.f32 %v8538_v51, %v2999_v38  ;;  %v3000_v18 = vmul.f32 %v8533_v2, %v2860_v63  ;;  %6899 = vmatmul.mubr.msk.bf16.vlgmr.msra.gmra.mrb[0].mxu1 %vm3094_vm3, %v8566_v46 }
 0x313   : > { %v3072_v55 = vmax.f32 %v3040_v53, 0.0  ;;  %v3041_v56 = vadd.f32 %v8538_v51, %v3002_v60  ;;  %6931 = vmatpush3.bf16.msra.mxu1 %v3544_v47  ;;  %6902 = vmatprep.mubr.msk.bf16.mxu1 %vm3094_vm3, %v8571_v7 }
 0x314   : > { %v3070_v61 = vmax.f32 %v3038_v15, 0.0  ;;  %v3039_v62 = vadd.f32 %v8538_v51, %v3000_v18  ;;  %7725 = vmatprep.subr.msk.bf16.mxu1 %vm3330_vm5, %v8576_v8  ;;  %v3240_v1 = vld [vmem:[#allocation3 + $0x61] sm:$0xff] }
 0x315   : > { %3161 = vst.msk [vmem:[#allocation3 + $0x91] sm:$0xff] %vm3094_vm3, %v3072_v55  ;;  %v3073_v4 = vmax.f32 %v3041_v56, 0.0  ;;  %v3238_v22 = vld [vmem:[#allocation3 + $0x49] sm:$0xff] }
 0x316   : > { %3159 = vst.msk [vmem:[#allocation3 + $0x79] sm:$0xff] %vm3094_vm3, %v3070_v61  ;;  %v3071_v5 = vmax.f32 %v3039_v62, 0.0  ;;  %v6878_v10 = vpop.f32.mrb[12].mxu0  ;;  %v3241_v11 = vld [vmem:[#allocation3 + $0x69] sm:$0xff] }
 0x317   : > { %3162 = vst.msk [vmem:[#allocation3 + $0x99] sm:$0xff] %vm3094_vm3, %v3073_v4  ;;  %v3005_v16 = vmul.f32 %v6878_v10, %v8533_v2  ;;  %v2873_v17 = vpop.f32.mrb[13].mxu0  ;;  %v3239_v26 = vld [vmem:[#allocation3 + $0x51] sm:$0xff]  ;;  %v8598_v25 = vpack.c.bf16 %v3241_v11, %v3240_v1 }
 0x318   : > { %3160 = vst.msk [vmem:[#allocation3 + $0x81] sm:$0xff] %vm3094_vm3, %v3071_v5  ;;  %v3003_v40 = vmul.f32 %v8533_v2, %v2873_v17  ;;  %v6879_v31 = vpop.f32.mrb[14].mxu0  ;;  %v8594_v0 = vpack.c.bf16 %v3239_v26, %v3238_v22 }
 0x319   : > { %v3044_v13 = vadd.f32 %v8538_v51, %v3005_v16  ;;  %v3006_v14 = vmul.f32 %v6879_v31, %v8533_v2  ;;  %v2876_v24 = vpop.f32.mrb[15].mxu0 }
 0x31a   : > { %v3042_v34 = vadd.f32 %v8538_v51, %v3003_v40  ;;  %v3004_v35 = vmul.f32 %v8533_v2, %v2876_v24  ;;  %6903 = vmatmul.mubr.msk.bf16.gmra.mrb[4].mxu1 %vm3094_vm3, %v8594_v0 }
 0x31b   : > { %v3076_v41 = vmax.f32 %v3044_v13, 0.0  ;;  %v3045_v45 = vadd.f32 %v8538_v51, %v3006_v14  ;;  %6906 = vmatprep.mubr.msk.bf16.mxu1 %vm3094_vm3, %v8598_v25 }
 0x31c   : > { %v3074_v48 = vmax.f32 %v3042_v34, 0.0  ;;  %v3043_v49 = vadd.f32 %v8538_v51, %v3004_v35  ;;  %v3244_v19 = vld [vmem:[#allocation3 + $0x91] sm:$0xff] }
 0x31d   : > { %3165 = vst.msk [vmem:[#allocation3 + $0xc1] sm:$0xff] %vm3094_vm3, %v3076_v41  ;;  %v3077_v50 = vmax.f32 %v3045_v45, 0.0  ;;  %v3242_v6 = vld [vmem:[#allocation3 + $0x79] sm:$0xff] }
 0x31e   : > { %3163 = vst.msk [vmem:[#allocation3 + $0xa9] sm:$0xff] %vm3094_vm3, %v3074_v48  ;;  %v3075_v54 = vmax.f32 %v3043_v49, 0.0  ;;  %v6882_v57 = vpop.f32.mrb[16].mxu0  ;;  %v3245_v58 = vld [vmem:[#allocation3 + $0x99] sm:$0xff] }
 0x31f   : > { %3166 = vst.msk [vmem:[#allocation3 + $0xc9] sm:$0xff] %vm3094_vm3, %v3077_v50  ;;  %v3009_v59 = vmul.f32 %v6882_v57, %v8533_v2  ;;  %v2889_v3 = vpop.f32.mrb[17].mxu0  ;;  %v3243_v9 = vld [vmem:[#allocation3 + $0x81] sm:$0xff]  ;;  %v8618_v43 = vpack.c.bf16 %v3245_v58, %v3244_v19 }
 0x320   : > { %3164 = vst.msk [vmem:[#allocation3 + $0xb1] sm:$0xff] %vm3094_vm3, %v3075_v54  ;;  %v3007_v28 = vmul.f32 %v8533_v2, %v2889_v3  ;;  %v6883_v42 = vpop.f32.mrb[18].mxu0  ;;  %v8614_v12 = vpack.c.bf16 %v3243_v9, %v3242_v6 }
 0x321   : > { %v3048_v20 = vadd.f32 %v8538_v51, %v3009_v59  ;;  %v3010_v32 = vmul.f32 %v6883_v42, %v8533_v2  ;;  %v2892_v37 = vpop.f32.mrb[19].mxu0 }
 0x322   : > { %v3046_v44 = vadd.f32 %v8538_v51, %v3007_v28  ;;  %v3008_v21 = vmul.f32 %v8533_v2, %v2892_v37  ;;  %6907 = vmatmul.mubr.msk.bf16.gmra.mrb[8].mxu1 %vm3094_vm3, %v8614_v12 }
 0x323   : > { %v3080_v36 = vmax.f32 %v3048_v20, 0.0  ;;  %v3049_v23 = vadd.f32 %v8538_v51, %v3010_v32  ;;  %6910 = vmatprep.mubr.msk.bf16.mxu1 %vm3094_vm3, %v8618_v43 }
 0x324   : > { %v3078_v27 = vmax.f32 %v3046_v44, 0.0  ;;  %v3047_v30 = vadd.f32 %v8538_v51, %v3008_v21  ;;  %v3248_v55 = vld [vmem:[#allocation3 + $0xc1] sm:$0xff] }
 0x325   : > { %3169 = vst.msk [vmem:[#allocation3 + $0xf1] sm:$0xff] %vm3094_vm3, %v3080_v36  ;;  %v3081_v33 = vmax.f32 %v3049_v23, 0.0  ;;  %v3246_v53 = vld [vmem:[#allocation3 + $0xa9] sm:$0xff] }
 0x326   : > { %3167 = vst.msk [vmem:[#allocation3 + $0xd9] sm:$0xff] %vm3094_vm3, %v3078_v27  ;;  %v3079_v29 = vmax.f32 %v3047_v30, 0.0  ;;  %v6886_v38 = vpop.f32.mrb[20].mxu0  ;;  %v3249_v39 = vld [vmem:[#allocation3 + $0xc9] sm:$0xff] }
 0x327   : > { %3170 = vst.msk [vmem:[#allocation3 + $0xf9] sm:$0xff] %vm3094_vm3, %v3081_v33  ;;  %v3013_v47 = vmul.f32 %v6886_v38, %v8533_v2  ;;  %v2905_v52 = vpop.f32.mrb[21].mxu0  ;;  %v3247_v60 = vld [vmem:[#allocation3 + $0xb1] sm:$0xff]  ;;  %v8638_v4 = vpack.c.bf16 %v3249_v39, %v3248_v55 }
 0x328   : > { %3168 = vst.msk [vmem:[#allocation3 + $0xe1] sm:$0xff] %vm3094_vm3, %v3079_v29  ;;  %v3011_v63 = vmul.f32 %v8533_v2, %v2905_v52  ;;  %v6887_v15 = vpop.f32.mrb[22].mxu0  ;;  %v8634_v18 = vpack.c.bf16 %v3247_v60, %v3246_v53 }
 0x329   : > { %v3052_v56 = vadd.f32 %v8538_v51, %v3013_v47  ;;  %v3014_v61 = vmul.f32 %v6887_v15, %v8533_v2  ;;  %v2908_v62 = vpop.f32.mrb[23].mxu0 }
 0x32a   : > { %v3050_v5 = vadd.f32 %v8538_v51, %v3011_v63  ;;  %v3012_v10 = vmul.f32 %v8533_v2, %v2908_v62  ;;  %6911 = vmatmul.mubr.msk.bf16.gmra.mrb[12].mxu1 %vm3094_vm3, %v8634_v18 }
 0x32b   : > { %v3084_v11 = vmax.f32 %v3052_v56, 0.0  ;;  %v3053_v16 = vadd.f32 %v8538_v51, %v3014_v61  ;;  %6914 = vmatprep.mubr.msk.bf16.mxu1 %vm3094_vm3, %v8638_v4 }
 0x32c   : > { %v3082_v17 = vmax.f32 %v3050_v5, 0.0  ;;  %v3051_v22 = vadd.f32 %v8538_v51, %v3012_v10  ;;  %v3252_v48 = vld [vmem:[#allocation3 + $0xf1] sm:$0xff] }
 0x32d   : > { %3173 = vst.msk [vmem:[#allocation3 + $0x121] sm:$0xff] %vm3094_vm3, %v3084_v11  ;;  %v3085_v26 = vmax.f32 %v3053_v16, 0.0  ;;  %v3250_v24 = vld [vmem:[#allocation3 + $0xd9] sm:$0xff] }
 0x32e   : > { %3171 = vst.msk [vmem:[#allocation3 + $0x109] sm:$0xff] %vm3094_vm3, %v3082_v17  ;;  %v3083_v40 = vmax.f32 %v3051_v22, 0.0  ;;  %v6890_v31 = vpop.f32.mrb[24].mxu0  ;;  %v3253_v1 = vld [vmem:[#allocation3 + $0xf9] sm:$0xff]  ;;  %v3184_v17 = vld [vmem:[#allocation3 + $0x8] sm:$0xff] }
 0x32f   : > { %3174 = vst.msk [vmem:[#allocation3 + $0x129] sm:$0xff] %vm3094_vm3, %v3085_v26  ;;  %v3017_v13 = vmul.f32 %v6890_v31, %v8533_v2  ;;  %v2921_v14 = vpop.f32.mrb[25].mxu0  ;;  %v3251_v34 = vld [vmem:[#allocation3 + $0xe1] sm:$0xff]  ;;  %v8658_v57 = vpack.c.bf16 %v3253_v1, %v3252_v48  ;;  %v8714_v48 = vld [vmem:[%s9204_s4 + $0xc] sm:$0xf] }
 0x330   : > { %3172 = vst.msk [vmem:[#allocation3 + $0x111] sm:$0xff] %vm3094_vm3, %v3083_v40  ;;  %v3015_v35 = vmul.f32 %v8533_v2, %v2921_v14  ;;  %v6891_v41 = vpop.f32.mrb[26].mxu0  ;;  %v8654_v45 = vpack.c.bf16 %v3251_v34, %v3250_v24  ;;  %v3186_v1 = vld [vmem:[#allocation3 + $0x20] sm:$0xff]  ;;  %v3185_v14 = vld [vmem:[#allocation3 + $0x18] sm:$0xff]  ;;  %v3806_v34 = vsel %vm3330_vm5, %v8576_v8, 0  ;;  %v3192_v8 = vld [vmem:[#allocation3 + $0x68] sm:$0xff] }
 0x331   : > { %v3056_v49 = vadd.f32 %v8538_v51, %v3017_v13  ;;  %v3018_v50 = vmul.f32 %v6891_v41, %v8533_v2  ;;  %v2924_v54 = vpop.f32.mrb[27].mxu0  ;;  %v3188_v13 = vld [vmem:[#allocation3 + $0x38] sm:$0xff]  ;;  %v8705_v24 = vpack.c.bf16 %v3186_v1, %v3185_v14  ;;  %v3710_v14 = vld [vmem:[#allocation3 + $0x22] sm:$0xff] }
 0x332   : > { %v3054_v58 = vadd.f32 %v8538_v51, %v3015_v35  ;;  %v3016_v59 = vmul.f32 %v8533_v2, %v2924_v54  ;;  %6915 = vmatmul.mubr.msk.bf16.gmra.mrb[16].mxu1 %vm3094_vm3, %v8654_v45  ;;  %v3187_v35 = vld [vmem:[#allocation3 + $0x30] sm:$0xff] }
 0x333   : > { %v3088_v3 = vmax.f32 %v3056_v49, 0.0  ;;  %v3057_v6 = vadd.f32 %v8538_v51, %v3018_v50  ;;  %6918 = vmatprep.mubr.msk.bf16.mxu1 %vm3094_vm3, %v8658_v57  ;;  %v8709_v41 = vpack.c.bf16 %v3188_v13, %v3187_v35  ;;  %v3190_v49 = vld [vmem:[#allocation3 + $0x50] sm:$0xff]  ;;  %v3189_v50 = vld [vmem:[#allocation3 + $0x48] sm:$0xff]  ;;  %v3709_v13 = vld [vmem:[#allocation3 + $0x1a] sm:$0xff] }
 0x334   : > { %v3086_v9 = vmax.f32 %v3054_v58, 0.0  ;;  %v3055_v28 = vadd.f32 %v8538_v51, %v3016_v59  ;;  %v3256_v33 = vld [vmem:[#allocation3 + $0x121] sm:$0xff]  ;;  %v8722_v54 = vpack.c.bf16 %v3190_v49, %v3189_v50  ;;  %v8775_v49 = vpack.c.bf16 %v3710_v14, %v3709_v13 }
 0x335   : > { %3177 = vst.msk [vmem:[#allocation3 + $0x151] sm:$0xff] %vm3094_vm3, %v3088_v3  ;;  %v3089_v42 = vmax.f32 %v3057_v6, 0.0  ;;  %v3254_v21 = vld [vmem:[#allocation3 + $0x109] sm:$0xff]  ;;  %v3191_v58 = vld [vmem:[#allocation3 + $0x60] sm:$0xff]  ;;  %v3196_v6 = vld [vmem:[#allocation3 + $0x98] sm:$0xff] }
 0x336   : > { %3175 = vst.msk [vmem:[#allocation3 + $0x139] sm:$0xff] %vm3094_vm3, %v3086_v9  ;;  %v3087_v19 = vmax.f32 %v3055_v28, 0.0  ;;  %v6894_v20 = vpop.f32.mrb[28].mxu0  ;;  %v3257_v32 = vld [vmem:[#allocation3 + $0x129] sm:$0xff]  ;;  %v8724_v59 = vpack.c.bf16 %v3192_v8, %v3191_v58  ;;  %v3194_v3 = vld [vmem:[#allocation3 + $0x80] sm:$0xff]  ;;  %v3193_v9 = vld [vmem:[#allocation3 + $0x78] sm:$0xff] }
 0x337   : > { %3178 = vst.msk [vmem:[#allocation3 + $0x159] sm:$0xff] %vm3094_vm3, %v3089_v42  ;;  %v3021_v37 = vmul.f32 %v6894_v20, %v8533_v2  ;;  %v2937_v44 = vpop.f32.mrb[29].mxu0  ;;  %v3255_v36 = vld [vmem:[#allocation3 + $0x111] sm:$0xff]  ;;  %v8678_v47 = vpack.c.bf16 %v3257_v32, %v3256_v33  ;;  %v8730_v28 = vpack.c.bf16 %v3194_v3, %v3193_v9  ;;  %v3200_v32 = vld [vmem:[#allocation3 + $0xc8] sm:$0xff]  ;;  %v3712_v35 = vld [vmem:[#allocation3 + $0x3a] sm:$0xff]  ;;  %v4100_v8 = vsel %vm3330_vm5, %v8714_v48, 0 }
 0x338   : > { %3176 = vst.msk [vmem:[#allocation3 + $0x141] sm:$0xff] %vm3094_vm3, %v3087_v19  ;;  %v3019_v23 = vmul.f32 %v8533_v2, %v2937_v44  ;;  %v6895_v27 = vpop.f32.mrb[30].mxu0  ;;  %v8674_v30 = vpack.c.bf16 %v3255_v36, %v3254_v21  ;;  %v3195_v42 = vld [vmem:[#allocation3 + $0x90] sm:$0xff]  ;;  %v3199_v21 = vld [vmem:[#allocation3 + $0xc0] sm:$0xff]  ;;  %v3201_v33 = vld [vmem:[#allocation3 + $0xd8] sm:$0xff] }
 0x339   : > { %v3060_v29 = vadd.f32 %v8538_v51, %v3021_v37  ;;  %v3022_v38 = vmul.f32 %v6895_v27, %v8533_v2  ;;  %v2940_v39 = vpop.f32.mrb[31].mxu0  ;;  %v8732_v19 = vpack.c.bf16 %v3196_v6, %v3195_v42  ;;  %v3198_v20 = vld [vmem:[#allocation3 + $0xb0] sm:$0xff]  ;;  %v3197_v37 = vld [vmem:[#allocation3 + $0xa8] sm:$0xff]  ;;  %v8740_v36 = vpack.c.bf16 %v3200_v32, %v3199_v21  ;;  %v3204_v27 = vld [vmem:[#allocation3 + $0xf8] sm:$0xff] }
 0x33a   : > { %v3058_v52 = vadd.f32 %v8538_v51, %v3019_v23  ;;  %v3020_v53 = vmul.f32 %v8533_v2, %v2940_v39  ;;  %6919 = vmatmul.mubr.msk.bf16.gmra.mrb[20].mxu1 %vm3094_vm3, %v8674_v30  ;;  %v8738_v44 = vpack.c.bf16 %v3198_v20, %v3197_v37  ;;  %v3202_v23 = vld [vmem:[#allocation3 + $0xe0] sm:$0xff]  ;;  %v3713_v3 = vld [vmem:[#allocation3 + $0x4a] sm:$0xff]  ;;  %v3714_v6 = vld [vmem:[#allocation3 + $0x52] sm:$0xff] }
 0x33b   : > { %v3092_v60 = vmax.f32 %v3060_v29, 0.0  ;;  %v3061_v63 = vadd.f32 %v8538_v51, %v3022_v38  ;;  %6922 = vmatprep.mubr.msk.bf16.mxu1 %vm3094_vm3, %v8678_v47  ;;  %v8746_v29 = vpack.c.bf16 %v3202_v23, %v3201_v33  ;;  %v3203_v38 = vld [vmem:[#allocation3 + $0xf0] sm:$0xff]  ;;  %v6193_v58 = vld [vmem:[%s9204_s4 + $0x10] sm:$0xf] }
 0x33c   : > { %v3090_v15 = vmax.f32 %v3058_v52, 0.0  ;;  %v3059_v55 = vadd.f32 %v8538_v51, %v3020_v53  ;;  %v3260_v11 = vld [vmem:[#allocation3 + $0x151] sm:$0xff]  ;;  %v3183_v51 = vld [vmem:[#allocation3] sm:$0xff]  ;;  %v8748_v39 = vpack.c.bf16 %v3204_v27, %v3203_v38  ;;  %v3208_v53 = vld [vmem:[#allocation3 + $0x128] sm:$0xff] }
 0x33d   : > { %3181 = vst.msk [vmem:[#allocation3 + $0x181] sm:$0xff] %vm3094_vm3, %v3092_v60  ;;  %v3093_v56 = vmax.f32 %v3061_v63, 0.0  ;;  %v3258_v2 = vld [vmem:[#allocation3 + $0x139] sm:$0xff]  ;;  %v3215_v40 = vpack.c.bf16 %v3184_v17, %v3183_v51  ;;  %v3206_v52 = vld [vmem:[#allocation3 + $0x110] sm:$0xff]  ;;  %v3205_v60 = vld [vmem:[#allocation3 + $0x108] sm:$0xff] }
 0x33e   : > { %3179 = vst.msk [vmem:[#allocation3 + $0x169] sm:$0xff] %vm3094_vm3, %v3090_v15  ;;  %v3091_v61 = vmax.f32 %v3059_v55, 0.0  ;;  %v3261_v62 = vld [vmem:[#allocation3 + $0x159] sm:$0xff]  ;;  %v8754_v63 = vpack.c.bf16 %v3206_v52, %v3205_v60  ;;  %v3707_v51 = vld [vmem:[#allocation3 + $0x2] sm:$0xff]  ;;  %v3708_v17 = vld [vmem:[#allocation3 + $0xa] sm:$0xff] }
 0x33f   : > { %3182 = vst.msk [vmem:[#allocation3 + $0x189] sm:$0xff] %vm3094_vm3, %v3093_v56  ;;  %v3259_v5 = vld [vmem:[#allocation3 + $0x141] sm:$0xff]  ;;  %v8694_v16 = vpack.c.bf16 %v3261_v62, %v3260_v11  ;;  %v3209_v62 = vld [vmem:[#allocation3 + $0x138] sm:$0xff]  ;;  %v3716_v42 = vld [vmem:[#allocation3 + $0x6a] sm:$0xff] }
 0x340   : > { %3180 = vst.msk [vmem:[#allocation3 + $0x171] sm:$0xff] %vm3094_vm3, %v3091_v61  ;;  %v8692_v10 = vpack.c.bf16 %v3259_v5, %v3258_v2  ;;  %v3207_v15 = vld [vmem:[#allocation3 + $0x120] sm:$0xff]  ;;  %v3212_v61 = vld [vmem:[#allocation3 + $0x158] sm:$0xff]  ;;  %v3211_v5 = vld [vmem:[#allocation3 + $0x150] sm:$0xff] }
 0x341   : > { %v8756_v55 = vpack.c.bf16 %v3208_v53, %v3207_v15  ;;  %v3210_v56 = vld [vmem:[#allocation3 + $0x140] sm:$0xff]  ;;  %v8764_v11 = vpack.c.bf16 %v3212_v61, %v3211_v5  ;;  %v3719_v21 = vld [vmem:[#allocation3 + $0x92] sm:$0xff]  ;;  %v3721_v38 = vld [vmem:[#allocation3 + $0xaa] sm:$0xff] }
 0x342   : > { %6923 = vmatmul.mubr.msk.bf16.gmra.mrb[24].mxu1 %vm3094_vm3, %v8692_v10  ;;  %v8762_v2 = vpack.c.bf16 %v3210_v56, %v3209_v62  ;;  %v3715_v9 = vld [vmem:[#allocation3 + $0x62] sm:$0xff]  ;;  %v3717_v32 = vld [vmem:[#allocation3 + $0x7a] sm:$0xff]  ;;  %v3722_v52 = vld [vmem:[#allocation3 + $0xb2] sm:$0xff] }
 0x343   : > { %6926 = vmatprep.mubr.msk.bf16.mxu1 %vm3094_vm3, %v8694_v16  ;;  %v8791_v20 = vpack.c.bf16 %v3716_v42, %v3715_v9  ;;  %v3718_v37 = vld [vmem:[#allocation3 + $0x82] sm:$0xff]  ;;  %v3720_v23 = vld [vmem:[#allocation3 + $0x9a] sm:$0xff]  ;;  %v3724_v60 = vld [vmem:[#allocation3 + $0xca] sm:$0xff]  ;;  %v8805_v15 = vpack.c.bf16 %v3722_v52, %v3721_v38  ;;  %v4394_v38 = vsel %vm3330_vm5, %v6193_v58, 0 }
 0x344   : > { %v8797_v27 = vpack.c.bf16 %v3718_v37, %v3717_v32  ;;  %v8799_v33 = vpack.c.bf16 %v3720_v23, %v3719_v21  ;;  %v3723_v53 = vld [vmem:[#allocation3 + $0xc2] sm:$0xff]  ;;  %v3725_v61 = vld [vmem:[#allocation3 + $0xda] sm:$0xff]  ;;  %v3727_v5 = vld [vmem:[#allocation3 + $0xf2] sm:$0xff] }
 0x345   : > { %v3262_v22 = vld [vmem:[#allocation3 + $0x169] sm:$0xff]  ;;  %v8807_v56 = vpack.c.bf16 %v3724_v60, %v3723_v53  ;;  %v3736_v9 = vld [vmem:[#allocation3 + $0x15a] sm:$0xff]  ;;  %v6210_v52 = vld [vmem:[%s9204_s4 + $0x14] sm:$0xf] }
 0x346   : > { %v3726_v62 = vld [vmem:[#allocation3 + $0xe2] sm:$0xff]  ;;  %v3732_v14 = vld [vmem:[#allocation3 + $0x12a] sm:$0xff]  ;;  %v4688_v60 = vsel %vm3330_vm5, %v6210_v52, 0 }
 0x347   : > { %v3263_v26 = vld [vmem:[#allocation3 + $0x171] sm:$0xff]  ;;  %v3731_v13 = vld [vmem:[#allocation3 + $0x122] sm:$0xff] }
 0x348   : > { %v8700_v31 = vpack.c.bf16 %v3263_v26, %v3262_v22  ;;  %v3214_v22 = vld [vmem:[#allocation3 + $0x170] sm:$0xff]  ;;  %v3213_v26 = vld [vmem:[#allocation3 + $0x168] sm:$0xff] }
 0x349   : > { %v8770_v1 = vpack.c.bf16 %v3214_v22, %v3213_v26  ;;  %v3729_v26 = vld [vmem:[#allocation3 + $0x10a] sm:$0xff]  ;;  %v3738_v21 = vld [vmem:[#allocation3 + $0x172] sm:$0xff] }
 0x34a   : > { %6927 = vmatmul.mubr.msk.bf16.gmra.mrb[28].mxu1 %vm3094_vm3, %v8700_v31  ;;  %v3737_v37 = vld [vmem:[#allocation3 + $0x16a] sm:$0xff] }
 0x34b   : > { %6932 = vmatprep.mubr.msk.bf16.mxu1 %vm3094_vm3, %v3215_v40  ;;  %v3739_v40 = vpack.c.bf16 %v3708_v17, %v3707_v51  ;;  %v3728_v51 = vld [vmem:[#allocation3 + $0xfa] sm:$0xff]  ;;  %v8813_v17 = vpack.c.bf16 %v3726_v62, %v3725_v61  ;;  %v8837_v23 = vpack.c.bf16 %v3738_v21, %v3737_v37  ;;  %v6227_v61 = vld [vmem:[%s9204_s4 + $0x18] sm:$0xf] }
 0x34c   : > { %v8815_v22 = vpack.c.bf16 %v3728_v51, %v3727_v5  ;;  %v6261_v51 = vld [vmem:[%s9204_s4 + $0x20] sm:$0xf] }
 0x352   : > { %6933 = vmatmul.mubr.msk.bf16.vlgmr.msra.gmra.mrb[0].mxu1 %vm3094_vm3, %v8705_v24 }
 0x353   : > { %6965 = vmatpush3.bf16.msra.mxu1 %v3806_v34  ;;  %6936 = vmatprep.mubr.msk.bf16.mxu1 %vm3094_vm3, %v8709_v41  ;;  %v3711_v34 = vld [vmem:[#allocation3 + $0x32] sm:$0xff] }
 0x354   : > { %7726 = vmatprep.subr.msk.bf16.mxu1 %vm3330_vm5, %v8714_v48  ;;  %v8779_v50 = vpack.c.bf16 %v3712_v35, %v3711_v34  ;;  %v8789_v48 = vpack.c.bf16 %v3714_v6, %v3713_v3  ;;  %v8823_v35 = vpack.c.bf16 %v3732_v14, %v3731_v13  ;;  %v3734_v3 = vld [vmem:[#allocation3 + $0x142] sm:$0xff]  ;;  %v3735_v6 = vld [vmem:[#allocation3 + $0x152] sm:$0xff] }
 0x355   : > { %v8831_v32 = vpack.c.bf16 %v3736_v9, %v3735_v6  ;;  %v5186_v14 = vld [vmem:[#allocation3 + $0x91] sm:$0xff] }
 0x35a   : > { %6937 = vmatmul.mubr.msk.bf16.gmra.mrb[4].mxu1 %vm3094_vm3, %v8722_v54 }
 0x35b   : > { %6940 = vmatprep.mubr.msk.bf16.mxu1 %vm3094_vm3, %v8724_v59 }
 0x362   : > { %6941 = vmatmul.mubr.msk.bf16.gmra.mrb[8].mxu1 %vm3094_vm3, %v8730_v28 }
 0x363   : > { %6944 = vmatprep.mubr.msk.bf16.mxu1 %vm3094_vm3, %v8732_v19 }
 0x36a   : > { %6945 = vmatmul.mubr.msk.bf16.gmra.mrb[12].mxu1 %vm3094_vm3, %v8738_v44 }
 0x36b   : > { %6948 = vmatprep.mubr.msk.bf16.mxu1 %vm3094_vm3, %v8740_v36 }
 0x372   : > { %6949 = vmatmul.mubr.msk.bf16.gmra.mrb[16].mxu1 %vm3094_vm3, %v8746_v29 }
 0x373   : > { %6952 = vmatprep.mubr.msk.bf16.mxu1 %vm3094_vm3, %v8748_v39 }
 0x37a   : > { %6953 = vmatmul.mubr.msk.bf16.gmra.mrb[20].mxu1 %vm3094_vm3, %v8754_v63 }
 0x37b   : > { %6956 = vmatprep.mubr.msk.bf16.mxu1 %vm3094_vm3, %v8756_v55 }
 0x382   : > { %6957 = vmatmul.mubr.msk.bf16.gmra.mrb[24].mxu1 %vm3094_vm3, %v8762_v2 }
 0x383   : > { %6960 = vmatprep.mubr.msk.bf16.mxu1 %vm3094_vm3, %v8764_v11 }
 0x38a   : > { %6961 = vmatmul.mubr.msk.bf16.gmra.mrb[28].mxu1 %vm3094_vm3, %v8770_v1 }
 0x38b   : > { %6966 = vmatprep.mubr.msk.bf16.mxu1 %vm3094_vm3, %v3739_v40  ;;  %v3730_v40 = vld [vmem:[#allocation3 + $0x112] sm:$0xff] }
 0x38c   : > { %v8821_v34 = vpack.c.bf16 %v3730_v40, %v3729_v26  ;;  %v5187_v26 = vld [vmem:[#allocation3 + $0x99] sm:$0xff] }
 0x38d   : > { %v5184_v40 = vld [vmem:[#allocation3 + $0x79] sm:$0xff] }
 0x392   : > { %6967 = vmatmul.mubr.msk.bf16.vlgmr.msra.gmra.mrb[0].mxu1 %vm3094_vm3, %v8775_v49 }
 0x393   : > { %6999 = vmatpush3.bf16.msra.mxu1 %v4100_v8  ;;  %6970 = vmatprep.mubr.msk.bf16.mxu1 %vm3094_vm3, %v8779_v50  ;;  %v3733_v8 = vld [vmem:[#allocation3 + $0x13a] sm:$0xff] }
 0x394   : > { %7727 = vmatprep.subr.msk.bf16.mxu1 %vm3330_vm5, %v6193_v58  ;;  %v8829_v42 = vpack.c.bf16 %v3734_v3, %v3733_v8  ;;  %v4031_v58 = vld [vmem:[#allocation3 + $0x180] sm:$0xff]  ;;  %v5214_v8 = vpack.c.bf16 %v5187_v26, %v5186_v14 }
 0x39a   : > { %6971 = vmatmul.mubr.msk.bf16.gmra.mrb[4].mxu1 %vm3094_vm3, %v8789_v48 }
 0x39b   : > { %6974 = vmatprep.mubr.msk.bf16.mxu1 %vm3094_vm3, %v8791_v20 }
 0x3a2   : > { %6975 = vmatmul.mubr.msk.bf16.gmra.mrb[8].mxu1 %vm3094_vm3, %v8797_v27 }
 0x3a3   : > { %6978 = vmatprep.mubr.msk.bf16.mxu1 %vm3094_vm3, %v8799_v33 }
 0x3aa   : > { %6979 = vmatmul.mubr.msk.bf16.gmra.mrb[12].mxu1 %vm3094_vm3, %v8805_v15 }
 0x3ab   : > { %6982 = vmatprep.mubr.msk.bf16.mxu1 %vm3094_vm3, %v8807_v56 }
 0x3b2   : > { %6983 = vmatmul.mubr.msk.bf16.gmra.mrb[16].mxu1 %vm3094_vm3, %v8813_v17 }
 0x3b3   : > { %6986 = vmatprep.mubr.msk.bf16.mxu1 %vm3094_vm3, %v8815_v22 }
 0x3ba   : > { %6987 = vmatmul.mubr.msk.bf16.gmra.mrb[20].mxu1 %vm3094_vm3, %v8821_v34 }
 0x3bb   : > { %6990 = vmatprep.mubr.msk.bf16.mxu1 %vm3094_vm3, %v8823_v35 }
 0x3c2   : > { %6991 = vmatmul.mubr.msk.bf16.gmra.mrb[24].mxu1 %vm3094_vm3, %v8829_v42 }
 0x3c3   : > { %6994 = vmatprep.mubr.msk.bf16.mxu1 %vm3094_vm3, %v8831_v32 }
 0x3ca   : > { %6995 = vmatmul.mubr.msk.bf16.gmra.mrb[28].mxu1 %vm3094_vm3, %v8837_v23 }
 0x3cb   : > { %7000 = vmatprep.mubr.msk.bf16.mxu1 %vm3094_vm3, %v8705_v24  ;;  %v4032_v24 = vld [vmem:[#allocation3 + $0x188] sm:$0xff] }
 0x3cc   : > { %v8876_v53 = vpack.c.bf16 %v4032_v24, %v4031_v58 }
 0x3d2   : > { %7001 = vmatmul.mubr.msk.bf16.vlgmr.msra.gmra.mrb[0].mxu1 %vm3094_vm3, %v8709_v41 }
 0x3d3   : > { %7033 = vmatpush3.bf16.msra.mxu1 %v4394_v38  ;;  %7004 = vmatprep.mubr.msk.bf16.mxu1 %vm3094_vm3, %v8722_v54 }
 0x3d4   : > { %7728 = vmatprep.subr.msk.bf16.mxu1 %vm3330_vm5, %v6210_v52 }
 0x3da   : > { %7005 = vmatmul.mubr.msk.bf16.gmra.mrb[4].mxu1 %vm3094_vm3, %v8724_v59 }
 0x3db   : > { %7008 = vmatprep.mubr.msk.bf16.mxu1 %vm3094_vm3, %v8730_v28 }
 0x3e2   : > { %7009 = vmatmul.mubr.msk.bf16.gmra.mrb[8].mxu1 %vm3094_vm3, %v8732_v19 }
 0x3e3   : > { %7012 = vmatprep.mubr.msk.bf16.mxu1 %vm3094_vm3, %v8738_v44 }
 0x3ea   : > { %7013 = vmatmul.mubr.msk.bf16.gmra.mrb[12].mxu1 %vm3094_vm3, %v8740_v36 }
 0x3eb   : > { %7016 = vmatprep.mubr.msk.bf16.mxu1 %vm3094_vm3, %v8746_v29 }
 0x3f2   : > { %7017 = vmatmul.mubr.msk.bf16.gmra.mrb[16].mxu1 %vm3094_vm3, %v8748_v39 }
 0x3f3   : > { %7020 = vmatprep.mubr.msk.bf16.mxu1 %vm3094_vm3, %v8754_v63 }
 0x3fa   : > { %7021 = vmatmul.mubr.msk.bf16.gmra.mrb[20].mxu1 %vm3094_vm3, %v8756_v55 }
 0x3fb   : > { %7024 = vmatprep.mubr.msk.bf16.mxu1 %vm3094_vm3, %v8762_v2 }
 0x402   : > { %7025 = vmatmul.mubr.msk.bf16.gmra.mrb[24].mxu1 %vm3094_vm3, %v8764_v11 }
 0x403   : > { %7028 = vmatprep.mubr.msk.bf16.mxu1 %vm3094_vm3, %v8770_v1 }
 0x40a   : > { %7029 = vmatmul.mubr.msk.bf16.gmra.mrb[28].mxu1 %vm3094_vm3, %v8876_v53 }
 0x40b   : > { %7034 = vmatprep.mubr.msk.bf16.mxu1 %vm3094_vm3, %v8566_v46  ;;  %v4326_v46 = vld [vmem:[#allocation3 + $0x189] sm:$0xff] }
 0x412   : > { %7035 = vmatmul.mubr.msk.bf16.vlgmr.msra.gmra.mrb[0].mxu1 %vm3094_vm3, %v8571_v7  ;;  %v4325_v7 = vld [vmem:[#allocation3 + $0x181] sm:$0xff] }
 0x413   : > { %7067 = vmatpush3.bf16.msra.mxu1 %v4688_v60  ;;  %7038 = vmatprep.mubr.msk.bf16.mxu1 %vm3094_vm3, %v8594_v0  ;;  %v8915_v0 = vpack.c.bf16 %v4326_v46, %v4325_v7 }
 0x414   : > { %7729 = vmatprep.subr.msk.bf16.mxu1 %vm3330_vm5, %v6227_v61 }
 0x41a   : > { %7039 = vmatmul.mubr.msk.bf16.gmra.mrb[4].mxu1 %vm3094_vm3, %v8598_v25  ;;  %v4983_v25 = vsel %vm3330_vm5, %v6227_v61, 0 }
 0x41b   : > { %7042 = vmatprep.mubr.msk.bf16.mxu1 %vm3094_vm3, %v8614_v12  ;;  %v6244_v12 = vld [vmem:[%s9204_s4 + $0x1c] sm:$0xf] }
 0x41c   : > { %v5277_v5 = vsel %vm3330_vm5, %v6244_v12, 0 }
 0x422   : > { %7043 = vmatmul.mubr.msk.bf16.gmra.mrb[8].mxu1 %vm3094_vm3, %v8618_v43  ;;  %v4619_v43 = vld [vmem:[#allocation3 + $0x182] sm:$0xff] }
 0x423   : > { %7046 = vmatprep.mubr.msk.bf16.mxu1 %vm3094_vm3, %v8634_v18 }
 0x42a   : > { %7047 = vmatmul.mubr.msk.bf16.gmra.mrb[12].mxu1 %vm3094_vm3, %v8638_v4 }
 0x42b   : > { %7050 = vmatprep.mubr.msk.bf16.mxu1 %vm3094_vm3, %v8654_v45 }
 0x432   : > { %7051 = vmatmul.mubr.msk.bf16.gmra.mrb[16].mxu1 %vm3094_vm3, %v8658_v57 }
 0x433   : > { %7054 = vmatprep.mubr.msk.bf16.mxu1 %vm3094_vm3, %v8674_v30 }
 0x43a   : > { %7055 = vmatmul.mubr.msk.bf16.gmra.mrb[20].mxu1 %vm3094_vm3, %v8678_v47 }
 0x43b   : > { %7058 = vmatprep.mubr.msk.bf16.mxu1 %vm3094_vm3, %v8692_v10 }
 0x442   : > { %7059 = vmatmul.mubr.msk.bf16.gmra.mrb[24].mxu1 %vm3094_vm3, %v8694_v16 }
 0x443   : > { %7062 = vmatprep.mubr.msk.bf16.mxu1 %vm3094_vm3, %v8700_v31 }
 0x44a   : > { %7063 = vmatmul.mubr.msk.bf16.gmra.mrb[28].mxu1 %vm3094_vm3, %v8915_v0 }
 0x44b   : > { %7068 = vmatprep.mubr.msk.bf16.mxu1 %vm3094_vm3, %v8775_v49  ;;  %v4620_v49 = vld [vmem:[#allocation3 + $0x18a] sm:$0xff] }
 0x44c   : > { %v8954_v62 = vpack.c.bf16 %v4620_v49, %v4619_v43 }
 0x452   : > { %7069 = vmatmul.mubr.msk.bf16.vlgmr.msra.gmra.mrb[0].mxu1 %vm3094_vm3, %v8779_v50 }
 0x453   : > { %7101 = vmatpush3.bf16.msra.mxu1 %v4983_v25  ;;  %7072 = vmatprep.mubr.msk.bf16.mxu1 %vm3094_vm3, %v8789_v48 }
 0x454   : > { %7730 = vmatprep.subr.msk.bf16.mxu1 %vm3330_vm5, %v6244_v12 }
 0x45a   : > { %7073 = vmatmul.mubr.msk.bf16.gmra.mrb[4].mxu1 %vm3094_vm3, %v8791_v20 }
 0x45b   : > { %7076 = vmatprep.mubr.msk.bf16.mxu1 %vm3094_vm3, %v8797_v27 }
 0x462   : > { %7077 = vmatmul.mubr.msk.bf16.gmra.mrb[8].mxu1 %vm3094_vm3, %v8799_v33 }
 0x463   : > { %7080 = vmatprep.mubr.msk.bf16.mxu1 %vm3094_vm3, %v8805_v15 }
 0x46a   : > { %7081 = vmatmul.mubr.msk.bf16.gmra.mrb[12].mxu1 %vm3094_vm3, %v8807_v56 }
 0x46b   : > { %7084 = vmatprep.mubr.msk.bf16.mxu1 %vm3094_vm3, %v8813_v17 }
 0x472   : > { %7085 = vmatmul.mubr.msk.bf16.gmra.mrb[16].mxu1 %vm3094_vm3, %v8815_v22 }
 0x473   : > { %7088 = vmatprep.mubr.msk.bf16.mxu1 %vm3094_vm3, %v8821_v34 }
 0x47a   : > { %7089 = vmatmul.mubr.msk.bf16.gmra.mrb[20].mxu1 %vm3094_vm3, %v8823_v35 }
 0x47b   : > { %7092 = vmatprep.mubr.msk.bf16.mxu1 %vm3094_vm3, %v8829_v42 }
 0x482   : > { %7093 = vmatmul.mubr.msk.bf16.gmra.mrb[24].mxu1 %vm3094_vm3, %v8831_v32 }
 0x483   : > { %7096 = vmatprep.mubr.msk.bf16.mxu1 %vm3094_vm3, %v8837_v23 }
 0x48a   : > { %7097 = vmatmul.mubr.msk.bf16.gmra.mrb[28].mxu1 %vm3094_vm3, %v8954_v62 }
 0x48b   : > { %7102 = vmatprep.mubr.msk.bf16.mxu1 %vm3094_vm3, %v8709_v41  ;;  %v4914_v41 = vld [vmem:[#allocation3 + $0x198] sm:$0xff] }
 0x492   : > { %7103 = vmatmul.mubr.msk.bf16.vlgmr.msra.gmra.mrb[0].mxu1 %vm3094_vm3, %v8722_v54  ;;  %v4915_v54 = vld [vmem:[#allocation3 + $0x1a0] sm:$0xff] }
 0x493   : > { %7135 = vmatpush3.bf16.msra.mxu1 %v5277_v5  ;;  %7106 = vmatprep.mubr.msk.bf16.mxu1 %vm3094_vm3, %v8724_v59  ;;  %v4931_v59 = vpack.c.bf16 %v4915_v54, %v4914_v41 }
 0x494   : > { %7731 = vmatprep.subr.msk.bf16.mxu1 %vm3330_vm5, %v6261_v51 }
 0x49a   : > { %7107 = vmatmul.mubr.msk.bf16.gmra.mrb[4].mxu1 %vm3094_vm3, %v8730_v28  ;;  %v5179_v28 = vld [vmem:[#allocation3 + $0x39] sm:$0xff] }
 0x49b   : > { %7110 = vmatprep.mubr.msk.bf16.mxu1 %vm3094_vm3, %v8732_v19  ;;  %v5178_v19 = vld [vmem:[#allocation3 + $0x31] sm:$0xff] }
 0x4a2   : > { %7111 = vmatmul.mubr.msk.bf16.gmra.mrb[8].mxu1 %vm3094_vm3, %v8738_v44  ;;  %v5210_v44 = vpack.c.bf16 %v5179_v28, %v5178_v19 }
 0x4a3   : > { %7114 = vmatprep.mubr.msk.bf16.mxu1 %vm3094_vm3, %v8740_v36  ;;  %v5181_v36 = vld [vmem:[#allocation3 + $0x51] sm:$0xff] }
 0x4aa   : > { %7115 = vmatmul.mubr.msk.bf16.gmra.mrb[12].mxu1 %vm3094_vm3, %v8746_v29  ;;  %v5183_v29 = vld [vmem:[#allocation3 + $0x69] sm:$0xff] }
 0x4ab   : > { %7118 = vmatprep.mubr.msk.bf16.mxu1 %vm3094_vm3, %v8748_v39  ;;  %v5180_v39 = vld [vmem:[#allocation3 + $0x49] sm:$0xff] }
 0x4b2   : > { %7119 = vmatmul.mubr.msk.bf16.gmra.mrb[16].mxu1 %vm3094_vm3, %v8754_v63  ;;  %v5211_v63 = vpack.c.bf16 %v5181_v36, %v5180_v39 }
 0x4b3   : > { %7122 = vmatprep.mubr.msk.bf16.mxu1 %vm3094_vm3, %v8756_v55  ;;  %v5571_v55 = vsel %vm3330_vm5, %v6261_v51, 0 }
 0x4ba   : > { %7123 = vmatmul.mubr.msk.bf16.gmra.mrb[20].mxu1 %vm3094_vm3, %v8762_v2  ;;  %v5182_v2 = vld [vmem:[#allocation3 + $0x61] sm:$0xff] }
 0x4bb   : > { %7126 = vmatprep.mubr.msk.bf16.mxu1 %vm3094_vm3, %v8764_v11  ;;  %v5212_v11 = vpack.c.bf16 %v5183_v29, %v5182_v2 }
 0x4c2   : > { %7127 = vmatmul.mubr.msk.bf16.gmra.mrb[24].mxu1 %vm3094_vm3, %v8770_v1  ;;  %v5185_v1 = vld [vmem:[#allocation3 + $0x81] sm:$0xff] }
 0x4c3   : > { %7130 = vmatprep.mubr.msk.bf16.mxu1 %vm3094_vm3, %v8876_v53  ;;  %v5213_v13 = vpack.c.bf16 %v5185_v1, %v5184_v40 }
 0x4ca   : > { %7131 = vmatmul.mubr.msk.bf16.gmra.mrb[28].mxu1 %vm3094_vm3, %v4931_v59 }
 0x4cb   : > { %7136 = vmatprep.mubr.msk.bf16.mxu1 %vm3094_vm3, %v5210_v44 }
 0x4d2   : > { %7137 = vmatmul.mubr.msk.bf16.vlgmr.msra.gmra.mrb[0].mxu1 %vm3094_vm3, %v5211_v63 }
 0x4d3   : > { %7169 = vmatpush3.bf16.msra.mxu1 %v5571_v55  ;;  %7140 = vmatprep.mubr.msk.bf16.mxu1 %vm3094_vm3, %v5212_v11 }
 0x4da   : > { %7141 = vmatmul.mubr.msk.bf16.gmra.mrb[4].mxu1 %vm3094_vm3, %v5213_v13 }
 0x4db   : > { %7144 = vmatprep.mubr.msk.bf16.mxu1 %vm3094_vm3, %v5214_v8 }
 0x4e2   : > { %7145 = vmatmul.mubr.msk.bf16.gmra.mrb[8].mxu1 %vm3094_vm3, %v8634_v18  ;;  %v5208_v18 = vld [vmem:[#allocation3 + $0x199] sm:$0xff] }
 0x4e3   : > { %7148 = vmatprep.mubr.msk.bf16.mxu1 %vm3094_vm3, %v8638_v4  ;;  %v5209_v4 = vld [vmem:[#allocation3 + $0x1a1] sm:$0xff] }
 0x4ea   : > { %7149 = vmatmul.mubr.msk.bf16.gmra.mrb[12].mxu1 %vm3094_vm3, %v8654_v45  ;;  %v5225_v45 = vpack.c.bf16 %v5209_v4, %v5208_v18 }
 0x4eb   : > { %7152 = vmatprep.mubr.msk.bf16.mxu1 %vm3094_vm3, %v8658_v57  ;;  %v5502_v57 = vld [vmem:[#allocation3 + $0x19a] sm:$0xff] }
 0x4f2   : > { %7153 = vmatmul.mubr.msk.bf16.gmra.mrb[16].mxu1 %vm3094_vm3, %v8674_v30  ;;  %v5503_v30 = vld [vmem:[#allocation3 + $0x1a2] sm:$0xff] }
 0x4f3   : > { %7156 = vmatprep.mubr.msk.bf16.mxu1 %vm3094_vm3, %v8678_v47  ;;  %v5519_v47 = vpack.c.bf16 %v5503_v30, %v5502_v57 }
 0x4fa   : > { %7157 = vmatmul.mubr.msk.bf16.gmra.mrb[20].mxu1 %vm3094_vm3, %v8692_v10  ;;  %v9055_v10 = vld [vmem:[%s9205_s5] ss:$0 sm:$0xff] }
 0x4fb   : > { %7160 = vmatprep.mubr.msk.bf16.mxu1 %vm3094_vm3, %v8694_v16 }
 0x502   : > { %7161 = vmatmul.mubr.msk.bf16.gmra.mrb[24].mxu1 %vm3094_vm3, %v8700_v31  ;;  %v9060_v31 = vld [vmem:[%s9206_s6] ss:$0 sm:$0xff] }
 0x503   : > { %7164 = vmatprep.mubr.msk.bf16.mxu1 %vm3094_vm3, %v8915_v0 }
 0x50a   : > { %7165 = vmatmul.mubr.msk.bf16.gmra.mrb[28].mxu1 %vm3094_vm3, %v5225_v45 }
 0x50b   : > { %7170 = vmatprep.mubr.msk.bf16.mxu1 %vm3094_vm3, %v8779_v50 }
 0x512   : > { %7171 = vmatmul.mubr.msk.bf16.vlgmr.msra.gmra.mrb[0].mxu1 %vm3094_vm3, %v8789_v48 }
 0x513   : > { %7174 = vmatprep.mubr.msk.bf16.mxu1 %vm3094_vm3, %v8791_v20 }
 0x51a   : > { %7175 = vmatmul.mubr.msk.bf16.gmra.mrb[4].mxu1 %vm3094_vm3, %v8797_v27 }
 0x51b   : > { %7178 = vmatprep.mubr.msk.bf16.mxu1 %vm3094_vm3, %v8799_v33 }
 0x522   : > { %7179 = vmatmul.mubr.msk.bf16.gmra.mrb[8].mxu1 %vm3094_vm3, %v8805_v15 }
 0x523   : > { %7182 = vmatprep.mubr.msk.bf16.mxu1 %vm3094_vm3, %v8807_v56 }
 0x52a   : > { %7183 = vmatmul.mubr.msk.bf16.gmra.mrb[12].mxu1 %vm3094_vm3, %v8813_v17 }
 0x52b   : > { %7186 = vmatprep.mubr.msk.bf16.mxu1 %vm3094_vm3, %v8815_v22 }
 0x532   : > { %7187 = vmatmul.mubr.msk.bf16.gmra.mrb[16].mxu1 %vm3094_vm3, %v8821_v34 }
 0x533   : > { %7190 = vmatprep.mubr.msk.bf16.mxu1 %vm3094_vm3, %v8823_v35 }
 0x53a   : > { %7191 = vmatmul.mubr.msk.bf16.gmra.mrb[20].mxu1 %vm3094_vm3, %v8829_v42 }
 0x53b   : > { %7194 = vmatprep.mubr.msk.bf16.mxu1 %vm3094_vm3, %v8831_v32 }
 0x542   : > { %7195 = vmatmul.mubr.msk.bf16.gmra.mrb[24].mxu1 %vm3094_vm3, %v8837_v23 }
 0x543   : > { %7198 = vmatprep.mubr.msk.bf16.mxu1 %vm3094_vm3, %v8954_v62 }
 0x54a   : > { %7199 = vmatmul.mubr.msk.bf16.gmra.mrb[28].mxu1 %vm3094_vm3, %v5519_v47 }
 0x5e5   : > { %v7172_v16 = vpop.f32.mrb[0].mxu1 }
 0x5e6   : > { %v5775_v50 = vmul.f32 %v7172_v16, %v9055_v10  ;;  %v5607_v48 = vpop.f32.mrb[1].mxu1 }
 0x5e7   : > { %v5773_v20 = vmul.f32 %v9055_v10, %v5607_v48  ;;  %v7173_v27 = vpop.f32.mrb[2].mxu1 }
 0x5e8   : > { %v5814_v33 = vadd.f32 %v9060_v31, %v5775_v50  ;;  %v5776_v15 = vmul.f32 %v7173_v27, %v9055_v10  ;;  %v5610_v56 = vpop.f32.mrb[3].mxu1 }
 0x5e9   : > { %v5812_v17 = vadd.f32 %v9060_v31, %v5773_v20  ;;  %v5774_v22 = vmul.f32 %v9055_v10, %v5610_v56 }
 0x5ea   : > { %v5846_v34 = vmax.f32 %v5814_v33, 0.0  ;;  %v5815_v35 = vadd.f32 %v9060_v31, %v5776_v15 }
 0x5eb   : > { %v5844_v3 = vmax.f32 %v5812_v17, 0.0  ;;  %v5813_v6 = vadd.f32 %v9060_v31, %v5774_v22 }
 0x5ec   : > { %5878 = vst.msk [vmem:[%s9071_s13 + $0x10] sm:$0xff] %vm3094_vm3, %v5846_v34  ;;  %v5847_v9 = vmax.f32 %v5815_v35, 0.0 }
 0x5ed   : > { %5876 = vst.msk [vmem:[%s9071_s13] sm:$0xff] %vm3094_vm3, %v5844_v3  ;;  %v5845_v42 = vmax.f32 %v5813_v6, 0.0  ;;  %v7176_v32 = vpop.f32.mrb[4].mxu1 }
 0x5ee   : > { %5879 = vst.msk [vmem:[%s9071_s13 + $0x18] sm:$0xff] %vm3094_vm3, %v5847_v9  ;;  %v5779_v37 = vmul.f32 %v7176_v32, %v9055_v10  ;;  %v5623_v21 = vpop.f32.mrb[5].mxu1 }
 0x5ef   : > { %5877 = vst.msk [vmem:[%s9071_s13 + $0x8] sm:$0xff] %vm3094_vm3, %v5845_v42  ;;  %v5777_v23 = vmul.f32 %v9055_v10, %v5623_v21  ;;  %v7177_v38 = vpop.f32.mrb[6].mxu1 }
 0x5f0   : > { %v5818_v52 = vadd.f32 %v9060_v31, %v5779_v37  ;;  %v5780_v24 = vmul.f32 %v7177_v38, %v9055_v10  ;;  %v5626_v58 = vpop.f32.mrb[7].mxu1 }
 0x5f1   : > { %v5816_v53 = vadd.f32 %v9060_v31, %v5777_v23  ;;  %v5778_v60 = vmul.f32 %v9055_v10, %v5626_v58 }
 0x5f2   : > { %v5850_v61 = vmax.f32 %v5818_v52, 0.0  ;;  %v5819_v46 = vadd.f32 %v9060_v31, %v5780_v24 }
 0x5f3   : > { %v5848_v7 = vmax.f32 %v5816_v53, 0.0  ;;  %v5817_v0 = vadd.f32 %v9060_v31, %v5778_v60 }
 0x5f4   : > { %5882 = vst.msk [vmem:[%s9071_s13 + $0x30] sm:$0xff] %vm3094_vm3, %v5850_v61  ;;  %v5851_v25 = vmax.f32 %v5819_v46, 0.0 }
 0x5f5   : > { %5880 = vst.msk [vmem:[%s9071_s13 + $0x20] sm:$0xff] %vm3094_vm3, %v5848_v7  ;;  %v5849_v12 = vmax.f32 %v5817_v0, 0.0  ;;  %v7180_v43 = vpop.f32.mrb[8].mxu1 }
 0x5f6   : > { %5883 = vst.msk [vmem:[%s9071_s13 + $0x38] sm:$0xff] %vm3094_vm3, %v5851_v25  ;;  %v5783_v49 = vmul.f32 %v7180_v43, %v9055_v10  ;;  %v5639_v62 = vpop.f32.mrb[9].mxu1 }
 0x5f7   : > { %5881 = vst.msk [vmem:[%s9071_s13 + $0x28] sm:$0xff] %vm3094_vm3, %v5849_v12  ;;  %v5781_v5 = vmul.f32 %v9055_v10, %v5639_v62  ;;  %v7181_v51 = vpop.f32.mrb[10].mxu1 }
 0x5f8   : > { %v5822_v41 = vadd.f32 %v9060_v31, %v5783_v49  ;;  %v5784_v54 = vmul.f32 %v7181_v51, %v9055_v10  ;;  %v5642_v59 = vpop.f32.mrb[11].mxu1 }
 0x5f9   : > { %v5820_v28 = vadd.f32 %v9060_v31, %v5781_v5  ;;  %v5782_v19 = vmul.f32 %v9055_v10, %v5642_v59 }
 0x5fa   : > { %v5854_v44 = vmax.f32 %v5822_v41, 0.0  ;;  %v5823_v36 = vadd.f32 %v9060_v31, %v5784_v54 }
 0x5fb   : > { %v5852_v29 = vmax.f32 %v5820_v28, 0.0  ;;  %v5821_v39 = vadd.f32 %v9060_v31, %v5782_v19 }
 0x5fc   : > { %5886 = vst.msk [vmem:[%s9071_s13 + $0x50] sm:$0xff] %vm3094_vm3, %v5854_v44  ;;  %v5855_v63 = vmax.f32 %v5823_v36, 0.0 }
 0x5fd   : > { %5884 = vst.msk [vmem:[%s9071_s13 + $0x40] sm:$0xff] %vm3094_vm3, %v5852_v29  ;;  %v5853_v55 = vmax.f32 %v5821_v39, 0.0  ;;  %v7184_v2 = vpop.f32.mrb[12].mxu1 }
 0x5fe   : > { %5887 = vst.msk [vmem:[%s9071_s13 + $0x58] sm:$0xff] %vm3094_vm3, %v5855_v63  ;;  %v5787_v11 = vmul.f32 %v7184_v2, %v9055_v10  ;;  %v5655_v1 = vpop.f32.mrb[13].mxu1 }
 0x5ff   : > { %5885 = vst.msk [vmem:[%s9071_s13 + $0x48] sm:$0xff] %vm3094_vm3, %v5853_v55  ;;  %v5785_v26 = vmul.f32 %v9055_v10, %v5655_v1  ;;  %v7185_v40 = vpop.f32.mrb[14].mxu1 }
 0x600   : > { %v5826_v13 = vadd.f32 %v9060_v31, %v5787_v11  ;;  %v5788_v14 = vmul.f32 %v7185_v40, %v9055_v10  ;;  %v5658_v8 = vpop.f32.mrb[15].mxu1 }
 0x601   : > { %v5824_v18 = vadd.f32 %v9060_v31, %v5785_v26  ;;  %v5786_v4 = vmul.f32 %v9055_v10, %v5658_v8 }
 0x602   : > { %v5858_v45 = vmax.f32 %v5826_v13, 0.0  ;;  %v5827_v57 = vadd.f32 %v9060_v31, %v5788_v14 }
 0x603   : > { %v5856_v30 = vmax.f32 %v5824_v18, 0.0  ;;  %v5825_v47 = vadd.f32 %v9060_v31, %v5786_v4 }
 0x604   : > { %5890 = vst.msk [vmem:[%s9071_s13 + $0x70] sm:$0xff] %vm3094_vm3, %v5858_v45  ;;  %v5859_v16 = vmax.f32 %v5827_v57, 0.0 }
 0x605   : > { %5888 = vst.msk [vmem:[%s9071_s13 + $0x60] sm:$0xff] %vm3094_vm3, %v5856_v30  ;;  %v5857_v50 = vmax.f32 %v5825_v47, 0.0  ;;  %v7188_v48 = vpop.f32.mrb[16].mxu1 }
 0x606   : > { %5891 = vst.msk [vmem:[%s9071_s13 + $0x78] sm:$0xff] %vm3094_vm3, %v5859_v16  ;;  %v5791_v20 = vmul.f32 %v7188_v48, %v9055_v10  ;;  %v5671_v27 = vpop.f32.mrb[17].mxu1 }
 0x607   : > { %5889 = vst.msk [vmem:[%s9071_s13 + $0x68] sm:$0xff] %vm3094_vm3, %v5857_v50  ;;  %v5789_v33 = vmul.f32 %v9055_v10, %v5671_v27  ;;  %v7189_v15 = vpop.f32.mrb[18].mxu1 }
 0x608   : > { %v5830_v56 = vadd.f32 %v9060_v31, %v5791_v20  ;;  %v5792_v17 = vmul.f32 %v7189_v15, %v9055_v10  ;;  %v5674_v22 = vpop.f32.mrb[19].mxu1 }
 0x609   : > { %v5828_v34 = vadd.f32 %v9060_v31, %v5789_v33  ;;  %v5790_v35 = vmul.f32 %v9055_v10, %v5674_v22 }
 0x60a   : > { %v5862_v3 = vmax.f32 %v5830_v56, 0.0  ;;  %v5831_v6 = vadd.f32 %v9060_v31, %v5792_v17 }
 0x60b   : > { %v5860_v9 = vmax.f32 %v5828_v34, 0.0  ;;  %v5829_v42 = vadd.f32 %v9060_v31, %v5790_v35 }
 0x60c   : > { %5894 = vst.msk [vmem:[%s9071_s13 + $0x90] sm:$0xff] %vm3094_vm3, %v5862_v3  ;;  %v5863_v32 = vmax.f32 %v5831_v6, 0.0 }
 0x60d   : > { %5892 = vst.msk [vmem:[%s9071_s13 + $0x80] sm:$0xff] %vm3094_vm3, %v5860_v9  ;;  %v5861_v37 = vmax.f32 %v5829_v42, 0.0  ;;  %v7192_v21 = vpop.f32.mrb[20].mxu1 }
 0x60e   : > { %5895 = vst.msk [vmem:[%s9071_s13 + $0x98] sm:$0xff] %vm3094_vm3, %v5863_v32  ;;  %v5795_v23 = vmul.f32 %v7192_v21, %v9055_v10  ;;  %v5687_v38 = vpop.f32.mrb[21].mxu1 }
 0x60f   : > { %5893 = vst.msk [vmem:[%s9071_s13 + $0x88] sm:$0xff] %vm3094_vm3, %v5861_v37  ;;  %v5793_v52 = vmul.f32 %v9055_v10, %v5687_v38  ;;  %v7193_v24 = vpop.f32.mrb[22].mxu1 }
 0x610   : > { %v5834_v58 = vadd.f32 %v9060_v31, %v5795_v23  ;;  %v5796_v53 = vmul.f32 %v7193_v24, %v9055_v10  ;;  %v5690_v60 = vpop.f32.mrb[23].mxu1 }
 0x611   : > { %v5832_v61 = vadd.f32 %v9060_v31, %v5793_v52  ;;  %v5794_v46 = vmul.f32 %v9055_v10, %v5690_v60 }
 0x612   : > { %v5866_v7 = vmax.f32 %v5834_v58, 0.0  ;;  %v5835_v0 = vadd.f32 %v9060_v31, %v5796_v53 }
 0x613   : > { %v5864_v25 = vmax.f32 %v5832_v61, 0.0  ;;  %v5833_v12 = vadd.f32 %v9060_v31, %v5794_v46 }
 0x614   : > { %5898 = vst.msk [vmem:[%s9071_s13 + $0xb0] sm:$0xff] %vm3094_vm3, %v5866_v7  ;;  %v5867_v43 = vmax.f32 %v5835_v0, 0.0 }
 0x615   : > { %5896 = vst.msk [vmem:[%s9071_s13 + $0xa0] sm:$0xff] %vm3094_vm3, %v5864_v25  ;;  %v5865_v49 = vmax.f32 %v5833_v12, 0.0  ;;  %v7196_v62 = vpop.f32.mrb[24].mxu1 }
 0x616   : > { %5899 = vst.msk [vmem:[%s9071_s13 + $0xb8] sm:$0xff] %vm3094_vm3, %v5867_v43  ;;  %v5799_v5 = vmul.f32 %v7196_v62, %v9055_v10  ;;  %v5703_v51 = vpop.f32.mrb[25].mxu1 }
 0x617   : > { %5897 = vst.msk [vmem:[%s9071_s13 + $0xa8] sm:$0xff] %vm3094_vm3, %v5865_v49  ;;  %v5797_v41 = vmul.f32 %v9055_v10, %v5703_v51  ;;  %v7197_v54 = vpop.f32.mrb[26].mxu1 }
 0x618   : > { %v5838_v59 = vadd.f32 %v9060_v31, %v5799_v5  ;;  %v5800_v28 = vmul.f32 %v7197_v54, %v9055_v10  ;;  %v5706_v19 = vpop.f32.mrb[27].mxu1 }
 0x619   : > { %v5836_v44 = vadd.f32 %v9060_v31, %v5797_v41  ;;  %v5798_v36 = vmul.f32 %v9055_v10, %v5706_v19 }
 0x61a   : > { %v5870_v29 = vmax.f32 %v5838_v59, 0.0  ;;  %v5839_v39 = vadd.f32 %v9060_v31, %v5800_v28 }
 0x61b   : > { %v5868_v63 = vmax.f32 %v5836_v44, 0.0  ;;  %v5837_v55 = vadd.f32 %v9060_v31, %v5798_v36 }
 0x61c   : > { %5902 = vst.msk [vmem:[%s9071_s13 + $0xd0] sm:$0xff] %vm3094_vm3, %v5870_v29  ;;  %v5871_v2 = vmax.f32 %v5839_v39, 0.0 }
 0x61d   : > { %5900 = vst.msk [vmem:[%s9071_s13 + $0xc0] sm:$0xff] %vm3094_vm3, %v5868_v63  ;;  %v5869_v11 = vmax.f32 %v5837_v55, 0.0  ;;  %v7200_v1 = vpop.f32.mrb[28].mxu1 }
 0x61e   : > { %5903 = vst.msk [vmem:[%s9071_s13 + $0xd8] sm:$0xff] %vm3094_vm3, %v5871_v2  ;;  %v5803_v26 = vmul.f32 %v7200_v1, %v9055_v10  ;;  %v5719_v40 = vpop.f32.mrb[29].mxu1 }
 0x61f   : > { %5901 = vst.msk [vmem:[%s9071_s13 + $0xc8] sm:$0xff] %vm3094_vm3, %v5869_v11  ;;  %v5801_v13 = vmul.f32 %v9055_v10, %v5719_v40  ;;  %v7201_v14 = vpop.f32.mrb[30].mxu1 }
 0x620   : > { %v5842_v8 = vadd.f32 %v9060_v31, %v5803_v26  ;;  %v5804_v18 = vmul.f32 %v7201_v14, %v9055_v10  ;;  %v5722_v4 = vpop.f32.mrb[31].mxu1 }
 0x621   : > { %v5840_v45 = vadd.f32 %v9060_v31, %v5801_v13  ;;  %v5802_v57 = vmul.f32 %v9055_v10, %v5722_v4 }
 0x622   : > { %v5874_v30 = vmax.f32 %v5842_v8, 0.0  ;;  %v5843_v47 = vadd.f32 %v9060_v31, %v5804_v18 }
 0x623   : > { %v5872_v16 = vmax.f32 %v5840_v45, 0.0  ;;  %v5841_v50 = vadd.f32 %v9060_v31, %v5802_v57 }
 0x624   : > { %5906 = vst.msk [vmem:[%s9071_s13 + $0xf0] sm:$0xff] %vm3094_vm3, %v5874_v30  ;;  %v5875_v48 = vmax.f32 %v5843_v47, 0.0 }
 0x625   : > { %5904 = vst.msk [vmem:[%s9071_s13 + $0xe0] sm:$0xff] %vm3094_vm3, %v5872_v16  ;;  %v5873_v20 = vmax.f32 %v5841_v50, 0.0 }
 0x626   : > { %5907 = vst.msk [vmem:[%s9071_s13 + $0xf8] sm:$0xff] %vm3094_vm3, %v5875_v48 }
 0x627   : > { %5905 = vst.msk [vmem:[%s9071_s13 + $0xe8] sm:$0xff] %vm3094_vm3, %v5873_v20 }
 0x628 PF: > { %s17_s24 = sadd.s32 1, %s7747_s24  }
 0x629   : > { %p14_p4 = scmp.ge.s32.totalorder %s17_s24, 4  }
 0x62b   :  { %16 = sbr.rel (!%p14_p4) target bundleno = 1 (0x1), region = 98 }

</bundles_post_ra>
